<compile_context>
chip_gen: v6e
topology: v6e:2x2x1
jax: 0.10.0
libtpu: 0.0.40
codegen_flags: <defaults>
</compile_context>

<pallas_src>
import jax
import jax.numpy as jnp
from jax.experimental import pallas as pl
from jax.experimental.pallas import tpu as pltpu

# ----------------------------- config (small, deterministic) ------------------
BATCH = 2
NUM_AGENTS = 2
NUM_ENTITIES = 3          # agents + landmarks
OBS_DIM = 2               # per-entity relative-location observation
PHYS_DIM = 2              # per-entity physical descriptor
HIDDEN = 32               # processing_hidden_size
FEATURE_VEC_SIZE = 32     # == HIDDEN so AdaptiveMaxPool2d((1, F)) == max over entity axis
VOCAB = 8                 # vocab_size
GOAL_SIZE = 3             # goal_size
MOVE_DIM = 2              # movement_dim_size
TIME_HORIZON = 2
MOVEMENT_STEP = 0.01
ENTROPY_WEIGHT = 1e-3     # penalize_entropy=True, entropy_normalization=None
# penalize_words=False -> WordCountingModule branch never runs.

AB = NUM_AGENTS * BATCH            # 4   fused (agent, batch) rows
NEAB = NUM_ENTITIES * AB           # 12  fused (entity, agent, batch) rows
NAAB = NUM_AGENTS * AB             # 8   fused (listener, speaker, batch) rows
GATES = 3 * HIDDEN                 # 96  consolidated [r|z|n] GRU gate width
ACT_IN = 3 * HIDDEN                # 96  action-GRU input (phys | utt | goal, lane-padded)
HEAD_HID = 2 * HIDDEN              # 64  merged movement+utterance hidden width
HEAD_OUT = MOVE_DIM + VOCAB        # 10  merged head output width
LANES = 128

VMEM = pltpu.MemorySpace.VMEM

# output slab lane map
OUT_LOC0 = 0                        # lanes [0, 2)   agent locations
OUT_UTT0 = MOVE_DIM                 # lanes [2, 10)  utterances
OUT_COST = MOVE_DIM + VOCAB         # lane 10        per-step game cost (broadcast)
OUT_ENT = OUT_COST + 1              # lane 11        per-step entropy term (broadcast)


# ----------------------------- static slab layouts -----------------------------
def _make_layout(entries, row_align):
    layout, r = {}, 0
    for name, rows, cols in entries:
        layout[name] = (r, rows, cols)
        r += -(-rows // row_align) * row_align
    return layout, r


# bf16 weight slab; offsets aligned to the bf16 sublane tile (16 rows).
_W_ENTRIES = [
    ("phys_wi", OBS_DIM + PHYS_DIM, GATES),
    ("phys_wh", HIDDEN, GATES),
    ("phys_wfc", HIDDEN, HIDDEN),
    ("utt_wi", VOCAB, GATES),
    ("utt_wh", HIDDEN, GATES),
    ("utt_wfc", HIDDEN, HIDDEN),
    ("gp_w1", HIDDEN, HIDDEN),
    ("gp_w2", HIDDEN, HIDDEN),          # logical (H, GOAL_SIZE), zero-padded lanes
    ("act_wi", ACT_IN, GATES),          # logical (2H+GOAL, 3H), zero-padded rows
    ("act_wh", HIDDEN, GATES),
    ("act_wfc", HIDDEN, HIDDEN),
    ("head_w1", HIDDEN, HEAD_HID),
    ("head_w2", HEAD_HID, HEAD_OUT),
]
W_LAYOUT, W_ROWS = _make_layout(_W_ENTRIES, 16)

# f32 bias slab: one row per bias vector.
_B_NAMES = ["phys_bi", "phys_bh", "phys_bfc", "utt_bi", "utt_bh", "utt_bfc",
            "gp_b1", "gp_b2", "act_bi", "act_bh", "act_bfc", "head_b1", "head_b2"]
B_ROW = {n: i for i, n in enumerate(_B_NAMES)}
B_ROWS = -(-len(_B_NAMES) // 8) * 8
_B_COLS = dict(phys_bi=GATES, phys_bh=GATES, phys_bfc=HIDDEN,
               utt_bi=GATES, utt_bh=GATES, utt_bfc=HIDDEN,
               gp_b1=HIDDEN, gp_b2=HIDDEN,
               act_bi=GATES, act_bh=GATES, act_bfc=HIDDEN,
               head_b1=HEAD_HID, head_b2=HEAD_OUT)

# f32 activation-input slab.
_IN_ENTRIES = [
    ("phys_x", NEAB, OBS_DIM + PHYS_DIM),   # rows = (entity, agent, batch)
    ("utt0", AB, VOCAB),                    # rows = (speaker, batch)
    ("goals", AB, HIDDEN),                  # (agent, batch); lanes >= GOAL_SIZE are zero
    ("goals_rep", NAAB, HIDDEN),            # (listener, speaker, batch) speaker's goal
    ("goal_loc", AB, MOVE_DIM),
    ("loc0", AB, MOVE_DIM),
]
IN_LAYOUT, IN_ROWS = _make_layout(_IN_ENTRIES, 8)


# ----------------------------- small math helpers (in-kernel safe) ------------
def _sigmoid(x):
    return 1.0 / (1.0 + jnp.exp(-x))


def _elu(x):
    # safe form: exp only on the non-positive branch
    return jnp.where(x > 0, x, jnp.exp(jnp.minimum(x, 0.0)) - 1.0)


def _softmax(x):
    m = jnp.max(x, axis=-1, keepdims=True)
    e = jnp.exp(x - m)
    return e * pl.reciprocal(jnp.sum(e, axis=-1, keepdims=True), approx=True)


# ----------------------------- the single fused kernel ------------------------
def _agent_kernel(in_ref, w_ref, b_ref, out_ref, xcat_ref, uttrep_ref):
    f32, bf16 = jnp.float32, jnp.bfloat16

    def W(name):
        r0, rows, cols = W_LAYOUT[name]
        return w_ref[r0:r0 + rows, 0:cols]

    def B(name, nrows):
        i = B_ROW[name]
        cols = _B_COLS[name]
        return jnp.broadcast_to(b_ref[i:i + 1, 0:cols], (nrows, cols))

    def IN(name):
        r0, rows, cols = IN_LAYOUT[name]
        return in_ref[r0:r0 + rows, 0:cols]

    def dot(x, w):  # bf16 MXU matmul, f32 accumulate
        return jnp.dot(x.astype(bf16), w, preferred_element_type=f32)

    out_ref[...] = jnp.zeros(out_ref.shape, f32)

    # ---- unpack everything ONCE (weight loads, bias broadcasts, invariants) ----
    w_phys_wh, w_phys_wfc = W("phys_wh"), W("phys_wfc")
    w_utt_wi, w_utt_wh, w_utt_wfc = W("utt_wi"), W("utt_wh"), W("utt_wfc")
    w_gp1, w_gp2 = W("gp_w1"), W("gp_w2")
    w_act_wi, w_act_wh, w_act_wfc = W("act_wi"), W("act_wh"), W("act_wfc")
    w_head1, w_head2 = W("head_w1"), W("head_w2")

    b_phys_bh, b_phys_bfc = B("phys_bh", NEAB), B("phys_bfc", NEAB)
    b_utt_bi, b_utt_bh, b_utt_bfc = B("utt_bi", NAAB), B("utt_bh", NAAB), B("utt_bfc", NAAB)
    b_gp1, b_gp2 = B("gp_b1", NAAB), B("gp_b2", NAAB)
    b_act_bi, b_act_bh, b_act_bfc = B("act_bi", AB), B("act_bh", AB), B("act_bfc", AB)
    b_head1, b_head2 = B("head_b1", AB), B("head_b2", AB)

    goals32 = IN("goals")        # (AB, 32)   lanes >= GOAL_SIZE are zero
    goals_rep = IN("goals_rep")  # (NAAB, 32) speaker's goal per (listener, speaker, batch)
    goal_loc = IN("goal_loc")    # (AB, 2)
    agent_loc = IN("loc0")       # (AB, 2)

    # physical-path input projection is time-invariant -> computed once
    gi_phys = dot(IN("phys_x"), W("phys_wi")) + B("phys_bi", NEAB)       # (NEAB, 96)

    # action-GRU input assembly buffer: [phys_feat | utt_feat | goal]; goal block is
    # time-invariant -> written once (its zero-padded lanes cover cols GOAL_SIZE..32).
    xcat_ref[:, 2 * HIDDEN:ACT_IN] = goals32

    # replicated-utterance buffer (listener-major stacking of the current utterances)
    utt0 = IN("utt0")                                                    # (AB, VOCAB)
    uttrep_ref[0:AB, :] = utt0
    uttrep_ref[AB:NAAB, :] = utt0

    def gru_fc(gi, h, wh, bh, wfc, bfc):
        """PyTorch GRUCell (gates consolidated into one 3H-wide matmul) + Linear + ELU."""
        gh = dot(h, wh) + bh
        r = _sigmoid(gi[:, 0:HIDDEN] + gh[:, 0:HIDDEN])
        z = _sigmoid(gi[:, HIDDEN:2 * HIDDEN] + gh[:, HIDDEN:2 * HIDDEN])
        n = jnp.tanh(gi[:, 2 * HIDDEN:GATES] + r * gh[:, 2 * HIDDEN:GATES])
        h_new = (1.0 - z) * n + z * h
        return _elu(dot(h_new, wfc) + bfc), h_new

    # recurrent memories: kernel-local, zero-initialized, resident for the whole horizon
    h_phys = jnp.zeros((NEAB, HIDDEN), f32)   # rows = (entity, agent, batch)
    h_utt = jnp.zeros((NAAB, HIDDEN), f32)    # rows = (listener, speaker, batch)
    h_act = jnp.zeros((AB, HIDDEN), f32)      # rows = (agent, batch)

    for t in range(TIME_HORIZON):   # tiny fixed horizon -> fully unrolled in-kernel
        # ---- physical processing: ONE GRU pass over all (entity, agent, batch) rows,
        #      then AdaptiveMaxPool2d((1, F)) == max over the entity groups -----------
        out_p, h_phys = gru_fc(gi_phys, h_phys, w_phys_wh, b_phys_bh,
                               w_phys_wfc, b_phys_bfc)                      # (12, 32)
        phys_feat = jnp.maximum(jnp.maximum(out_p[0:AB], out_p[AB:2 * AB]),
                                out_p[2 * AB:3 * AB])                       # (AB, 32)
        xcat_ref[:, 0:HIDDEN] = phys_feat

        # ---- utterance processing: ONE GRU pass over all (listener, speaker, batch)
        #      rows (the reference loops over ALL agents incl. self, so self is pooled).
        gi_utt = dot(uttrep_ref[...], w_utt_wi) + b_utt_bi                  # (8, 96)
        out_u, h_utt = gru_fc(gi_utt, h_utt, w_utt_wh, b_utt_bh,
                              w_utt_wfc, b_utt_bfc)                         # (8, 32)

        # goal prediction for every (listener, speaker) pair; keep the cost as a vector
        # partial sum (lanes >= GOAL_SIZE are zero on both sides), reduce once per step.
        gp_h = _elu(dot(out_u, w_gp1) + b_gp1)                              # (8, 32)
        gp = dot(gp_h, w_gp2) + b_gp2                                       # (8, 32)
        goal_sq = (gp - goals_rep) ** 2

        # AdaptiveMaxPool2d over the speaker axis for each listener -> action input buf
        xcat_ref[0:BATCH, HIDDEN:2 * HIDDEN] = jnp.maximum(out_u[0:BATCH],
                                                           out_u[BATCH:AB])
        xcat_ref[BATCH:AB, HIDDEN:2 * HIDDEN] = jnp.maximum(out_u[AB:AB + BATCH],
                                                            out_u[AB + BATCH:NAAB])

        # ---- action processing: ONE fused input projection over [phys | utt | goal] --
        gi_act = dot(xcat_ref[...], w_act_wi) + b_act_bi                    # (AB, 96)
        act_out, h_act = gru_fc(gi_act, h_act, w_act_wh, b_act_bh,
                                w_act_wfc, b_act_bfc)                       # (AB, 32)

        # ---- merged movement + utterance heads (shared hidden, block-diag output) ----
        head_h = _elu(dot(act_out, w_head1) + b_head1)                      # (AB, 64)
        head_o = dot(head_h, w_head2) + b_head2                             # (AB, 10)
        movement = (jnp.tanh(head_o[:, 0:MOVE_DIM]) * (2.0 * MOVEMENT_STEP)
                    - MOVEMENT_STEP)
        # TODO(synk): Gumbel-softmax (train) / hard one-hot (eval) omitted; plain softmax.
        utt_new = _softmax(head_o[:, MOVE_DIM:MOVE_DIM + VOCAB])            # (AB, 8)

        # ---- game step / costs (synthetic quadratic stand-in, see TODO above) --------
        agent_loc = agent_loc + movement
        phys_sq = (agent_loc - goal_loc) ** 2
        cost_t = jnp.sum(goal_sq, keepdims=True) + jnp.sum(phys_sq, keepdims=True)

        # penalize_entropy with entropy_normalization=None: normalize by the GLOBAL sum
        # over the whole (agents x batch x vocab) block, as in the reference.
        s_inv = pl.reciprocal(jnp.sum(utt_new, keepdims=True), approx=True)
        pn = utt_new * s_inv
        ent_t = -jnp.sum(pn * jnp.log(pn + 1e-20), keepdims=True) * ENTROPY_WEIGHT

        # ---- packed per-step outputs (single lane-padded VMEM slab) -------------------
        out_ref[t, :, OUT_LOC0:OUT_LOC0 + MOVE_DIM] = agent_loc
        out_ref[t, :, OUT_UTT0:OUT_UTT0 + VOCAB] = utt_new
        out_ref[t, :, OUT_COST:OUT_COST + 1] = jnp.broadcast_to(cost_t, (AB, 1))
        out_ref[t, :, OUT_ENT:OUT_ENT + 1] = jnp.broadcast_to(ent_t, (AB, 1))

        # the new utterances feed the next step's listening pass
        uttrep_ref[0:AB, :] = utt_new
        uttrep_ref[AB:NAAB, :] = utt_new


_fused_forward = pl.pallas_call(
    _agent_kernel,
    out_shape=jax.ShapeDtypeStruct((TIME_HORIZON, AB, LANES), jnp.float32),
    in_specs=[pl.BlockSpec(memory_space=VMEM)] * 3,
    out_specs=pl.BlockSpec(memory_space=VMEM),
    scratch_shapes=[
        pltpu.VMEM((AB, ACT_IN), jnp.float32),     # action-GRU input assembly
        pltpu.VMEM((NAAB, VOCAB), jnp.float32),    # replicated current utterances
    ],
)


# ----------------------------- slab packing -----------------------------------
def _pack_slab(arrays, layout, total_rows, dtype):
    slab = jnp.zeros((total_rows, LANES), dtype)
    for name, arr in arrays.items():
        r0, _, _ = layout[name]
        slab = slab.at[r0:r0 + arr.shape[0], 0:arr.shape[1]].set(arr.astype(dtype))
    return slab


def pack_params(params):
    """One-time layout transform: merge the movement/utterance heads, pad the action
    input weight to a lane-aligned (96, 96) block, and pack everything into one bf16
    weight slab + one f32 bias slab (2 parameter DMAs instead of ~31)."""
    pp, pu, pa = params["physical"], params["utterance"], params["action"]
    gp, mv, uh = params["goal_predictor"], params["movement"], params["utter_head"]

    act_wi = jnp.zeros((ACT_IN, GATES), jnp.float32)
    act_wi = act_wi.at[0:2 * HIDDEN + GOAL_SIZE, :].set(pa["wi"])

    head_w2 = jnp.zeros((HEAD_HID, HEAD_OUT), jnp.float32)
    head_w2 = head_w2.at[0:HIDDEN, 0:MOVE_DIM].set(mv["w2"])
    head_w2 = head_w2.at[HIDDEN:, MOVE_DIM:].set(uh["w2"])

    weights = {
        "phys_wi": pp["wi"], "phys_wh": pp["wh"], "phys_wfc": pp["wfc"],
        "utt_wi": pu["wi"], "utt_wh": pu["wh"], "utt_wfc": pu["wfc"],
        "gp_w1": gp["w1"], "gp_w2": gp["w2"],
        "act_wi": act_wi, "act_wh": pa["wh"], "act_wfc": pa["wfc"],
        "head_w1": jnp.concatenate([mv["w1"], uh["w1"]], axis=1),
        "head_w2": head_w2,
    }
    biases = {
        "phys_bi": pp["bi"], "phys_bh": pp["bh"], "phys_bfc": pp["bfc"],
        "utt_bi": pu["bi"], "utt_bh": pu["bh"], "utt_bfc": pu["bfc"],
        "gp_b1": gp["b1"], "gp_b2": gp["b2"],
        "act_bi": pa["bi"], "act_bh": pa["bh"], "act_bfc": pa["bfc"],
        "head_b1": jnp.concatenate([mv["b1"], uh["b1"]], axis=1),
        "head_b2": jnp.concatenate([mv["b2"], uh["b2"]], axis=1),
    }
    w_slab = _pack_slab(weights, W_LAYOUT, W_ROWS, jnp.bfloat16)
    b_layout = {n: (B_ROW[n], 1, LANES) for n in _B_NAMES}
    b_slab = _pack_slab(biases, b_layout, B_ROWS, jnp.float32)
    return w_slab, b_slab


# ----------------------------- whole-forward wrapper (one jit, one launch) ----
@jax.jit
def agent_forward(w_slab, b_slab, game):
    obs = game["observations"]                 # (B, NA, NE, OBS)
    phys = game["physical"]                    # (B, NE, PHYS)

    # physical-path inputs stacked (entity, agent, batch)-major
    obs_e = jnp.transpose(obs, (2, 1, 0, 3)).reshape(NEAB, OBS_DIM)
    phys_e = jnp.broadcast_to(
        jnp.transpose(phys, (1, 0, 2))[:, None],
        (NUM_ENTITIES, NUM_AGENTS, BATCH, PHYS_DIM)).reshape(NEAB, PHYS_DIM)
    phys_x = jnp.concatenate([obs_e, phys_e], axis=-1)      # (NEAB, OBS+PHYS)

    def flat_ab(x):  # (B, NA, d) -> (NA*B, d), agent-major / batch-minor
        return jnp.transpose(x, (1, 0, 2)).reshape(AB, x.shape[-1])

    goals_ab = flat_ab(game["observed_goals"])
    inputs = {
        "phys_x": phys_x,
        "utt0": flat_ab(game["utterances"]),
        "goals": goals_ab,
        "goals_rep": jnp.concatenate([goals_ab, goals_ab], axis=0),
        "goal_loc": flat_ab(game["goal_locations"]),
        "loc0": flat_ab(game["locations"][:, :NUM_AGENTS]),
    }
    in_slab = _pack_slab(inputs, IN_LAYOUT, IN_ROWS, jnp.float32)

    out = _fused_forward(in_slab, w_slab, b_slab)            # (T, AB, 128)

    loc = out[:, :, OUT_LOC0:OUT_LOC0 + MOVE_DIM]
    utt = out[:, :, OUT_UTT0:OUT_UTT0 + VOCAB]
    cost = out[:, 0, OUT_COST]                                # (T,) per-step game cost
    ent = out[:, 0, OUT_ENT]                                  # (T,) per-step entropy term
    total_cost = jnp.sum(cost + ent).reshape(1)

    # vectorized post-processing over the whole horizon (one reshape/transpose/update)
    loc_bt = jnp.transpose(loc.reshape(TIME_HORIZON, NUM_AGENTS, BATCH, MOVE_DIM),
                           (0, 2, 1, 3))
    utt_bt = jnp.transpose(utt.reshape(TIME_HORIZON, NUM_AGENTS, BATCH, VOCAB),
                           (0, 2, 1, 3))
    locations = jnp.broadcast_to(game["locations"][None],
                                 (TIME_HORIZON,) + game["locations"].shape)
    locations = locations.at[:, :, :NUM_AGENTS].set(loc_bt)
    return total_cost, dict(locations=locations, loss_total=cost, utterances=utt_bt)


def agent_forward_with_logs(w_slab, b_slab, game):
    total_cost, logs = agent_forward(w_slab, b_slab, game)
    epoch_logs = [dict(locations=logs["locations"][t],
                       loss_total=logs["loss_total"][t],
                       utterances=logs["utterances"][t])
                  for t in range(TIME_HORIZON)]
    return total_cost, epoch_logs


# ----------------------------- deterministic parameter init -------------------
def _linear_init(key, in_dim, out_dim):
    kw, kb = jax.random.split(key)
    s = 1.0 / (in_dim ** 0.5)
    w = jax.random.uniform(kw, (in_dim, out_dim), jnp.float32, -s, s)
    b = jax.random.uniform(kb, (1, out_dim), jnp.float32, -s, s)
    return w, b


def init_processing_params(key, in_dim, hidden):
    ks = jax.random.split(key, 7)
    wir, bir = _linear_init(ks[0], in_dim, hidden)
    whr, bhr = _linear_init(ks[1], hidden, hidden)
    wiz, biz = _linear_init(ks[2], in_dim, hidden)
    whz, bhz = _linear_init(ks[3], hidden, hidden)
    win, bin_ = _linear_init(ks[4], in_dim, hidden)
    whn, bhn = _linear_init(ks[5], hidden, hidden)
    wfc, bfc = _linear_init(ks[6], hidden, hidden)
    # consolidated gate weights: [r | z | n] along the output (lane) axis
    return dict(
        wi=jnp.concatenate([wir, wiz, win], axis=1),   # (in, 3H)
        bi=jnp.concatenate([bir, biz, bin_], axis=1),  # (1, 3H)
        wh=jnp.concatenate([whr, whz, whn], axis=1),   # (H, 3H)
        bh=jnp.concatenate([bhr, bhz, bhn], axis=1),   # (1, 3H)
        wfc=wfc, bfc=bfc)


def init_mlp2_params(key, in_dim, hid, out_dim):
    k1, k2 = jax.random.split(key)
    w1, b1 = _linear_init(k1, in_dim, hid)
    w2, b2 = _linear_init(k2, hid, out_dim)
    return dict(w1=w1, b1=b1, w2=w2, b2=b2)


def init_agent_params(key):
    ks = jax.random.split(key, 6)
    return dict(
        physical=init_processing_params(ks[0], OBS_DIM + PHYS_DIM, HIDDEN),
        utterance=init_processing_params(ks[1], VOCAB, HIDDEN),
        goal_predictor=init_mlp2_params(ks[2], HIDDEN, HIDDEN, GOAL_SIZE),
        action=init_processing_params(ks[3], 2 * HIDDEN + GOAL_SIZE, HIDDEN),
        movement=init_mlp2_params(ks[4], HIDDEN, HIDDEN, MOVE_DIM),
        utter_head=init_mlp2_params(ks[5], HIDDEN, HIDDEN, VOCAB),
    )


def make_game(key):
    ks = jax.random.split(key, 6)
    return dict(
        observations=jax.random.normal(
            ks[0], (BATCH, NUM_AGENTS, NUM_ENTITIES, OBS_DIM), jnp.float32),
        physical=jax.random.normal(ks[1], (BATCH, NUM_ENTITIES, PHYS_DIM), jnp.float32),
        utterances=jax.nn.softmax(
            jax.random.normal(ks[2], (BATCH, NUM_AGENTS, VOCAB), jnp.float32), axis=-1),
        observed_goals=jax.random.normal(ks[3], (BATCH, NUM_AGENTS, GOAL_SIZE), jnp.float32),
        locations=jax.random.normal(ks[4], (BATCH, NUM_ENTITIES, MOVE_DIM), jnp.float32),
        goal_locations=jax.random.normal(ks[5], (BATCH, NUM_AGENTS, MOVE_DIM), jnp.float32),
    )


# ----------------------------- main --------------------------------------------
if __name__ == "__main__":
    root_key = jax.random.PRNGKey(0)
    pkey, gkey = jax.random.split(root_key)
    params = init_agent_params(pkey)
    game = make_game(gkey)

    w_slab, b_slab = pack_params(params)     # one-time parameter layout transform
    total_cost, epoch_logs = agent_forward_with_logs(w_slab, b_slab, game)

    total_cost = jax.block_until_ready(total_cost)
    for log in epoch_logs:
        jax.block_until_ready(log["utterances"])
        jax.block_until_ready(log["locations"])

    print("KERNEL_OK")
</pallas_src>

<mosaic_0001>
module attributes {stable_mosaic.version = 11 : i64} {
  func.func @_agent_kernel(%arg0: memref<56x128xf32, #tpu.memory_space<vmem>>, %arg1: memref<480x128xbf16, #tpu.memory_space<vmem>>, %arg2: memref<16x128xf32, #tpu.memory_space<vmem>>, %arg3: memref<2x4x128xf32, #tpu.memory_space<vmem>>, %arg4: memref<4x96xf32, #tpu.memory_space<vmem>>, %arg5: memref<8x8xf32, #tpu.memory_space<vmem>>) attributes {dimension_semantics = [], scalar_prefetch = 0 : i64, scratch_operands = 2 : i64, tpu.core_type = #tpu.core_type<tc>} {
    %cst = arith.constant 0.000000e+00 : f32
    %0 = vector.broadcast %cst : f32 to vector<2x4x128xf32>
    %c0 = arith.constant 0 : index
    %c0_0 = arith.constant 0 : index
    %c0_1 = arith.constant 0 : index
    %1 = vector.load %arg3[%c0, %c0_0, %c0_1] : memref<2x4x128xf32, #tpu.memory_space<vmem>>, vector<2x4x128xf32>
    tpu.vector_store %arg3[%c0, %c0_0, %c0_1], %0 {strides = array<i32>} : memref<2x4x128xf32, #tpu.memory_space<vmem>>, vector<2x4x128xf32>,
    %c16 = arith.constant 16 : index
    %c0_2 = arith.constant 0 : index
    %2 = vector.load %arg1[%c16, %c0_2] : memref<480x128xbf16, #tpu.memory_space<vmem>>, vector<32x96xbf16>
    %c48 = arith.constant 48 : index
    %c0_3 = arith.constant 0 : index
    %3 = vector.load %arg1[%c48, %c0_3] : memref<480x128xbf16, #tpu.memory_space<vmem>>, vector<32x32xbf16>
    %c80 = arith.constant 80 : index
    %c0_4 = arith.constant 0 : index
    %4 = vector.load %arg1[%c80, %c0_4] : memref<480x128xbf16, #tpu.memory_space<vmem>>, vector<8x96xbf16>
    %c96 = arith.constant 96 : index
    %c0_5 = arith.constant 0 : index
    %5 = vector.load %arg1[%c96, %c0_5] : memref<480x128xbf16, #tpu.memory_space<vmem>>, vector<32x96xbf16>
    %c128 = arith.constant 128 : index
    %c0_6 = arith.constant 0 : index
    %6 = vector.load %arg1[%c128, %c0_6] : memref<480x128xbf16, #tpu.memory_space<vmem>>, vector<32x32xbf16>
    %c160 = arith.constant 160 : index
    %c0_7 = arith.constant 0 : index
    %7 = vector.load %arg1[%c160, %c0_7] : memref<480x128xbf16, #tpu.memory_space<vmem>>, vector<32x32xbf16>
    %c192 = arith.constant 192 : index
    %c0_8 = arith.constant 0 : index
    %8 = vector.load %arg1[%c192, %c0_8] : memref<480x128xbf16, #tpu.memory_space<vmem>>, vector<32x32xbf16>
    %c224 = arith.constant 224 : index
    %c0_9 = arith.constant 0 : index
    %9 = vector.load %arg1[%c224, %c0_9] : memref<480x128xbf16, #tpu.memory_space<vmem>>, vector<96x96xbf16>
    %c320 = arith.constant 320 : index
    %c0_10 = arith.constant 0 : index
    %10 = vector.load %arg1[%c320, %c0_10] : memref<480x128xbf16, #tpu.memory_space<vmem>>, vector<32x96xbf16>
    %c352 = arith.constant 352 : index
    %c0_11 = arith.constant 0 : index
    %11 = vector.load %arg1[%c352, %c0_11] : memref<480x128xbf16, #tpu.memory_space<vmem>>, vector<32x32xbf16>
    %c384 = arith.constant 384 : index
    %c0_12 = arith.constant 0 : index
    %12 = vector.load %arg1[%c384, %c0_12] : memref<480x128xbf16, #tpu.memory_space<vmem>>, vector<32x64xbf16>
    %c416 = arith.constant 416 : index
    %c0_13 = arith.constant 0 : index
    %13 = vector.load %arg1[%c416, %c0_13] : memref<480x128xbf16, #tpu.memory_space<vmem>>, vector<64x10xbf16>
    %c1 = arith.constant 1 : index
    %c0_14 = arith.constant 0 : index
    %14 = vector.load %arg2[%c1, %c0_14] : memref<16x128xf32, #tpu.memory_space<vmem>>, vector<1x96xf32>
    %15 = vector.shape_cast %14 : vector<1x96xf32> to vector<1x96xf32>
    %16 = vector.broadcast %15 : vector<1x96xf32> to vector<12x96xf32>
    %c2 = arith.constant 2 : index
    %c0_15 = arith.constant 0 : index
    %17 = vector.load %arg2[%c2, %c0_15] : memref<16x128xf32, #tpu.memory_space<vmem>>, vector<1x32xf32>
    %18 = vector.shape_cast %17 : vector<1x32xf32> to vector<1x32xf32>
    %19 = vector.broadcast %18 : vector<1x32xf32> to vector<12x32xf32>
    %c3 = arith.constant 3 : index
    %c0_16 = arith.constant 0 : index
    %20 = vector.load %arg2[%c3, %c0_16] : memref<16x128xf32, #tpu.memory_space<vmem>>, vector<1x96xf32>
    %21 = vector.shape_cast %20 : vector<1x96xf32> to vector<1x96xf32>
    %22 = vector.broadcast %21 : vector<1x96xf32> to vector<8x96xf32>
    %c4 = arith.constant 4 : index
    %c0_17 = arith.constant 0 : index
    %23 = vector.load %arg2[%c4, %c0_17] : memref<16x128xf32, #tpu.memory_space<vmem>>, vector<1x96xf32>
    %24 = vector.shape_cast %23 : vector<1x96xf32> to vector<1x96xf32>
    %25 = vector.broadcast %24 : vector<1x96xf32> to vector<8x96xf32>
    %c5 = arith.constant 5 : index
    %c0_18 = arith.constant 0 : index
    %26 = vector.load %arg2[%c5, %c0_18] : memref<16x128xf32, #tpu.memory_space<vmem>>, vector<1x32xf32>
    %27 = vector.shape_cast %26 : vector<1x32xf32> to vector<1x32xf32>
    %28 = vector.broadcast %27 : vector<1x32xf32> to vector<8x32xf32>
    %c6 = arith.constant 6 : index
    %c0_19 = arith.constant 0 : index
    %29 = vector.load %arg2[%c6, %c0_19] : memref<16x128xf32, #tpu.memory_space<vmem>>, vector<1x32xf32>
    %30 = vector.shape_cast %29 : vector<1x32xf32> to vector<1x32xf32>
    %31 = vector.broadcast %30 : vector<1x32xf32> to vector<8x32xf32>
    %c7 = arith.constant 7 : index
    %c0_20 = arith.constant 0 : index
    %32 = vector.load %arg2[%c7, %c0_20] : memref<16x128xf32, #tpu.memory_space<vmem>>, vector<1x32xf32>
    %33 = vector.shape_cast %32 : vector<1x32xf32> to vector<1x32xf32>
    %34 = vector.broadcast %33 : vector<1x32xf32> to vector<8x32xf32>
    %c8 = arith.constant 8 : index
    %c0_21 = arith.constant 0 : index
    %35 = vector.load %arg2[%c8, %c0_21] : memref<16x128xf32, #tpu.memory_space<vmem>>, vector<1x96xf32>
    %36 = vector.shape_cast %35 : vector<1x96xf32> to vector<1x96xf32>
    %37 = vector.broadcast %36 : vector<1x96xf32> to vector<4x96xf32>
    %c9 = arith.constant 9 : index
    %c0_22 = arith.constant 0 : index
    %38 = vector.load %arg2[%c9, %c0_22] : memref<16x128xf32, #tpu.memory_space<vmem>>, vector<1x96xf32>
    %39 = vector.shape_cast %38 : vector<1x96xf32> to vector<1x96xf32>
    %40 = vector.broadcast %39 : vector<1x96xf32> to vector<4x96xf32>
    %c10 = arith.constant 10 : index
    %c0_23 = arith.constant 0 : index
    %41 = vector.load %arg2[%c10, %c0_23] : memref<16x128xf32, #tpu.memory_space<vmem>>, vector<1x32xf32>
    %42 = vector.shape_cast %41 : vector<1x32xf32> to vector<1x32xf32>
    %43 = vector.broadcast %42 : vector<1x32xf32> to vector<4x32xf32>
    %c11 = arith.constant 11 : index
    %c0_24 = arith.constant 0 : index
    %44 = vector.load %arg2[%c11, %c0_24] : memref<16x128xf32, #tpu.memory_space<vmem>>, vector<1x64xf32>
    %45 = vector.shape_cast %44 : vector<1x64xf32> to vector<1x64xf32>
    %46 = vector.broadcast %45 : vector<1x64xf32> to vector<4x64xf32>
    %c12 = arith.constant 12 : index
    %c0_25 = arith.constant 0 : index
    %47 = vector.load %arg2[%c12, %c0_25] : memref<16x128xf32, #tpu.memory_space<vmem>>, vector<1x10xf32>
    %48 = vector.shape_cast %47 : vector<1x10xf32> to vector<1x10xf32>
    %49 = vector.broadcast %48 : vector<1x10xf32> to vector<4x10xf32>
    %c24 = arith.constant 24 : index
    %c0_26 = arith.constant 0 : index
    %50 = vector.load %arg0[%c24, %c0_26] : memref<56x128xf32, #tpu.memory_space<vmem>>, vector<4x32xf32>
    %c32 = arith.constant 32 : index
    %c0_27 = arith.constant 0 : index
    %51 = vector.load %arg0[%c32, %c0_27] : memref<56x128xf32, #tpu.memory_space<vmem>>, vector<8x32xf32>
    %c40 = arith.constant 40 : index
    %c0_28 = arith.constant 0 : index
    %52 = vector.load %arg0[%c40, %c0_28] : memref<56x128xf32, #tpu.memory_space<vmem>>, vector<4x2xf32>
    %c48_29 = arith.constant 48 : index
    %c0_30 = arith.constant 0 : index
    %53 = vector.load %arg0[%c48_29, %c0_30] : memref<56x128xf32, #tpu.memory_space<vmem>>, vector<4x2xf32>
    %c0_31 = arith.constant 0 : index
    %c0_32 = arith.constant 0 : index
    %54 = vector.load %arg0[%c0_31, %c0_32] : memref<56x128xf32, #tpu.memory_space<vmem>>, vector<12x4xf32>
    %c0_33 = arith.constant 0 : index
    %c0_34 = arith.constant 0 : index
    %55 = vector.load %arg1[%c0_33, %c0_34] : memref<480x128xbf16, #tpu.memory_space<vmem>>, vector<4x96xbf16>
    %56 = arith.truncf %54 : vector<12x4xf32> to vector<12x4xbf16>
    %cst_35 = arith.constant dense<0.000000e+00> : vector<12x96xf32>
    %57 = tpu.matmul %56, %55, %cst_35 {dimension_numbers = #tpu.dot_dimension_numbers<[1], [0], [0], [1], [0, 0, 1, 1], [], []>} : vector<12x4xbf16>, vector<4x96xbf16>, vector<12x96xf32> -> vector<12x96xf32>
    %c0_36 = arith.constant 0 : index
    %c0_37 = arith.constant 0 : index
    %58 = vector.load %arg2[%c0_36, %c0_37] : memref<16x128xf32, #tpu.memory_space<vmem>>, vector<1x96xf32>
    %59 = vector.shape_cast %58 : vector<1x96xf32> to vector<1x96xf32>
    %60 = vector.broadcast %59 : vector<1x96xf32> to vector<12x96xf32>
    %61 = arith.addf %57, %60 : vector<12x96xf32>
    %c0_38 = arith.constant 0 : index
    %c64 = arith.constant 64 : index
    %62 = vector.load %arg4[%c0_38, %c64] : memref<4x96xf32, #tpu.memory_space<vmem>>, vector<4x32xf32>
    tpu.vector_store %arg4[%c0_38, %c64], %50 {strides = array<i32>} : memref<4x96xf32, #tpu.memory_space<vmem>>, vector<4x32xf32>,
    %c16_39 = arith.constant 16 : index
    %c0_40 = arith.constant 0 : index
    %63 = vector.load %arg0[%c16_39, %c0_40] : memref<56x128xf32, #tpu.memory_space<vmem>>, vector<4x8xf32>
    %c0_41 = arith.constant 0 : index
    %c0_42 = arith.constant 0 : index
    %64 = vector.load %arg5[%c0_41, %c0_42] : memref<8x8xf32, #tpu.memory_space<vmem>>, vector<4x8xf32>
    tpu.vector_store %arg5[%c0_41, %c0_42], %63 {strides = array<i32>} : memref<8x8xf32, #tpu.memory_space<vmem>>, vector<4x8xf32>,
    %c4_43 = arith.constant 4 : index
    %c0_44 = arith.constant 0 : index
    %65 = vector.load %arg5[%c4_43, %c0_44] : memref<8x8xf32, #tpu.memory_space<vmem>>, vector<4x8xf32>
    tpu.vector_store %arg5[%c4_43, %c0_44], %63 {strides = array<i32>} : memref<8x8xf32, #tpu.memory_space<vmem>>, vector<4x8xf32>,
    %cst_45 = arith.constant 0.000000e+00 : f32
    %66 = vector.broadcast %cst_45 : f32 to vector<12x32xf32>
    %cst_46 = arith.constant 0.000000e+00 : f32
    %67 = vector.broadcast %cst_46 : f32 to vector<8x32xf32>
    %cst_47 = arith.constant 0.000000e+00 : f32
    %68 = vector.broadcast %cst_47 : f32 to vector<4x32xf32>
    %69 = arith.truncf %66 : vector<12x32xf32> to vector<12x32xbf16>
    %cst_48 = arith.constant dense<0.000000e+00> : vector<12x96xf32>
    %70 = tpu.matmul %69, %2, %cst_48 {dimension_numbers = #tpu.dot_dimension_numbers<[1], [0], [0], [1], [0, 0, 1, 1], [], []>} : vector<12x32xbf16>, vector<32x96xbf16>, vector<12x96xf32> -> vector<12x96xf32>
    %71 = arith.addf %70, %16 : vector<12x96xf32>
    %72 = vector.extract_strided_slice %61 {offsets = [0, 0], sizes = [12, 32], strides = [1, 1]} : vector<12x96xf32> to vector<12x32xf32>
    %73 = vector.extract_strided_slice %71 {offsets = [0, 0], sizes = [12, 32], strides = [1, 1]} : vector<12x96xf32> to vector<12x32xf32>
    %74 = arith.addf %72, %73 : vector<12x32xf32>
    %cst_49 = arith.constant 0.000000e+00 : f32
    %75 = vector.broadcast %cst_49 : f32 to vector<12x32xf32>
    %76 = arith.subf %75, %74 : vector<12x32xf32>
    %77 = math.exp %76 : vector<12x32xf32>
    %cst_50 = arith.constant 1.000000e+00 : f32
    %78 = vector.broadcast %cst_50 : f32 to vector<12x32xf32>
    %79 = arith.addf %78, %77 : vector<12x32xf32>
    %cst_51 = arith.constant 1.000000e+00 : f32
    %80 = vector.broadcast %cst_51 : f32 to vector<12x32xf32>
    %81 = arith.divf %80, %79 : vector<12x32xf32>
    %82 = vector.extract_strided_slice %61 {offsets = [0, 32], sizes = [12, 32], strides = [1, 1]} : vector<12x96xf32> to vector<12x32xf32>
    %83 = vector.extract_strided_slice %71 {offsets = [0, 32], sizes = [12, 32], strides = [1, 1]} : vector<12x96xf32> to vector<12x32xf32>
    %84 = arith.addf %82, %83 : vector<12x32xf32>
    %cst_52 = arith.constant 0.000000e+00 : f32
    %85 = vector.broadcast %cst_52 : f32 to vector<12x32xf32>
    %86 = arith.subf %85, %84 : vector<12x32xf32>
    %87 = math.exp %86 : vector<12x32xf32>
    %cst_53 = arith.constant 1.000000e+00 : f32
    %88 = vector.broadcast %cst_53 : f32 to vector<12x32xf32>
    %89 = arith.addf %88, %87 : vector<12x32xf32>
    %cst_54 = arith.constant 1.000000e+00 : f32
    %90 = vector.broadcast %cst_54 : f32 to vector<12x32xf32>
    %91 = arith.divf %90, %89 : vector<12x32xf32>
    %92 = vector.extract_strided_slice %61 {offsets = [0, 64], sizes = [12, 32], strides = [1, 1]} : vector<12x96xf32> to vector<12x32xf32>
    %93 = vector.extract_strided_slice %71 {offsets = [0, 64], sizes = [12, 32], strides = [1, 1]} : vector<12x96xf32> to vector<12x32xf32>
    %94 = arith.mulf %81, %93 : vector<12x32xf32>
    %95 = arith.addf %92, %94 : vector<12x32xf32>
    %96 = math.tanh %95 : vector<12x32xf32>
    %cst_55 = arith.constant 1.000000e+00 : f32
    %97 = vector.broadcast %cst_55 : f32 to vector<12x32xf32>
    %98 = arith.subf %97, %91 : vector<12x32xf32>
    %99 = arith.mulf %98, %96 : vector<12x32xf32>
    %100 = arith.mulf %91, %66 : vector<12x32xf32>
    %101 = arith.addf %99, %100 : vector<12x32xf32>
    %102 = arith.truncf %101 : vector<12x32xf32> to vector<12x32xbf16>
    %cst_56 = arith.constant dense<0.000000e+00> : vector<12x32xf32>
    %103 = tpu.matmul %102, %3, %cst_56 {dimension_numbers = #tpu.dot_dimension_numbers<[1], [0], [0], [1], [0, 0, 1, 1], [], []>} : vector<12x32xbf16>, vector<32x32xbf16>, vector<12x32xf32> -> vector<12x32xf32>
    %104 = arith.addf %103, %19 : vector<12x32xf32>
    %cst_57 = arith.constant 0.000000e+00 : f32
    %105 = vector.broadcast %cst_57 : f32 to vector<12x32xf32>
    %106 = arith.cmpf ogt, %104, %105 : vector<12x32xf32>
    %cst_58 = arith.constant 0.000000e+00 : f32
    %107 = vector.broadcast %cst_58 : f32 to vector<12x32xf32>
    %108 = arith.minimumf %104, %107 : vector<12x32xf32>
    %109 = math.exp %108 : vector<12x32xf32>
    %cst_59 = arith.constant 1.000000e+00 : f32
    %110 = vector.broadcast %cst_59 : f32 to vector<12x32xf32>
    %111 = arith.subf %109, %110 : vector<12x32xf32>
    %112 = arith.select %106, %104, %111 : vector<12x32xi1>, vector<12x32xf32>
    %113 = vector.extract_strided_slice %112 {offsets = [0, 0], sizes = [4, 32], strides = [1, 1]} : vector<12x32xf32> to vector<4x32xf32>
    %114 = vector.extract_strided_slice %112 {offsets = [4, 0], sizes = [4, 32], strides = [1, 1]} : vector<12x32xf32> to vector<4x32xf32>
    %115 = arith.maximumf %113, %114 : vector<4x32xf32>
    %116 = vector.extract_strided_slice %112 {offsets = [8, 0], sizes = [4, 32], strides = [1, 1]} : vector<12x32xf32> to vector<4x32xf32>
    %117 = arith.maximumf %115, %116 : vector<4x32xf32>
    %c0_60 = arith.constant 0 : index
    %c0_61 = arith.constant 0 : index
    %118 = vector.load %arg4[%c0_60, %c0_61] : memref<4x96xf32, #tpu.memory_space<vmem>>, vector<4x32xf32>
    tpu.vector_store %arg4[%c0_60, %c0_61], %117 {strides = array<i32>} : memref<4x96xf32, #tpu.memory_space<vmem>>, vector<4x32xf32>,
    %c0_62 = arith.constant 0 : index
    %c0_63 = arith.constant 0 : index
    %119 = vector.load %arg5[%c0_62, %c0_63] : memref<8x8xf32, #tpu.memory_space<vmem>>, vector<8x8xf32>
    %120 = arith.truncf %119 : vector<8x8xf32> to vector<8x8xbf16>
    %cst_64 = arith.constant dense<0.000000e+00> : vector<8x96xf32>
    %121 = tpu.matmul %120, %4, %cst_64 {dimension_numbers = #tpu.dot_dimension_numbers<[1], [0], [0], [1], [0, 0, 1, 1], [], []>} : vector<8x8xbf16>, vector<8x96xbf16>, vector<8x96xf32> -> vector<8x96xf32>
    %122 = arith.addf %121, %22 : vector<8x96xf32>
    %123 = arith.truncf %67 : vector<8x32xf32> to vector<8x32xbf16>
    %cst_65 = arith.constant dense<0.000000e+00> : vector<8x96xf32>
    %124 = tpu.matmul %123, %5, %cst_65 {dimension_numbers = #tpu.dot_dimension_numbers<[1], [0], [0], [1], [0, 0, 1, 1], [], []>} : vector<8x32xbf16>, vector<32x96xbf16>, vector<8x96xf32> -> vector<8x96xf32>
    %125 = arith.addf %124, %25 : vector<8x96xf32>
    %126 = vector.extract_strided_slice %122 {offsets = [0, 0], sizes = [8, 32], strides = [1, 1]} : vector<8x96xf32> to vector<8x32xf32>
    %127 = vector.extract_strided_slice %125 {offsets = [0, 0], sizes = [8, 32], strides = [1, 1]} : vector<8x96xf32> to vector<8x32xf32>
    %128 = arith.addf %126, %127 : vector<8x32xf32>
    %cst_66 = arith.constant 0.000000e+00 : f32
    %129 = vector.broadcast %cst_66 : f32 to vector<8x32xf32>
    %130 = arith.subf %129, %128 : vector<8x32xf32>
    %131 = math.exp %130 : vector<8x32xf32>
    %cst_67 = arith.constant 1.000000e+00 : f32
    %132 = vector.broadcast %cst_67 : f32 to vector<8x32xf32>
    %133 = arith.addf %132, %131 : vector<8x32xf32>
    %cst_68 = arith.constant 1.000000e+00 : f32
    %134 = vector.broadcast %cst_68 : f32 to vector<8x32xf32>
    %135 = arith.divf %134, %133 : vector<8x32xf32>
    %136 = vector.extract_strided_slice %122 {offsets = [0, 32], sizes = [8, 32], strides = [1, 1]} : vector<8x96xf32> to vector<8x32xf32>
    %137 = vector.extract_strided_slice %125 {offsets = [0, 32], sizes = [8, 32], strides = [1, 1]} : vector<8x96xf32> to vector<8x32xf32>
    %138 = arith.addf %136, %137 : vector<8x32xf32>
    %cst_69 = arith.constant 0.000000e+00 : f32
    %139 = vector.broadcast %cst_69 : f32 to vector<8x32xf32>
    %140 = arith.subf %139, %138 : vector<8x32xf32>
    %141 = math.exp %140 : vector<8x32xf32>
    %cst_70 = arith.constant 1.000000e+00 : f32
    %142 = vector.broadcast %cst_70 : f32 to vector<8x32xf32>
    %143 = arith.addf %142, %141 : vector<8x32xf32>
    %cst_71 = arith.constant 1.000000e+00 : f32
    %144 = vector.broadcast %cst_71 : f32 to vector<8x32xf32>
    %145 = arith.divf %144, %143 : vector<8x32xf32>
    %146 = vector.extract_strided_slice %122 {offsets = [0, 64], sizes = [8, 32], strides = [1, 1]} : vector<8x96xf32> to vector<8x32xf32>
    %147 = vector.extract_strided_slice %125 {offsets = [0, 64], sizes = [8, 32], strides = [1, 1]} : vector<8x96xf32> to vector<8x32xf32>
    %148 = arith.mulf %135, %147 : vector<8x32xf32>
    %149 = arith.addf %146, %148 : vector<8x32xf32>
    %150 = math.tanh %149 : vector<8x32xf32>
    %cst_72 = arith.constant 1.000000e+00 : f32
    %151 = vector.broadcast %cst_72 : f32 to vector<8x32xf32>
    %152 = arith.subf %151, %145 : vector<8x32xf32>
    %153 = arith.mulf %152, %150 : vector<8x32xf32>
    %154 = arith.mulf %145, %67 : vector<8x32xf32>
    %155 = arith.addf %153, %154 : vector<8x32xf32>
    %156 = arith.truncf %155 : vector<8x32xf32> to vector<8x32xbf16>
    %cst_73 = arith.constant dense<0.000000e+00> : vector<8x32xf32>
    %157 = tpu.matmul %156, %6, %cst_73 {dimension_numbers = #tpu.dot_dimension_numbers<[1], [0], [0], [1], [0, 0, 1, 1], [], []>} : vector<8x32xbf16>, vector<32x32xbf16>, vector<8x32xf32> -> vector<8x32xf32>
    %158 = arith.addf %157, %28 : vector<8x32xf32>
    %cst_74 = arith.constant 0.000000e+00 : f32
    %159 = vector.broadcast %cst_74 : f32 to vector<8x32xf32>
    %160 = arith.cmpf ogt, %158, %159 : vector<8x32xf32>
    %cst_75 = arith.constant 0.000000e+00 : f32
    %161 = vector.broadcast %cst_75 : f32 to vector<8x32xf32>
    %162 = arith.minimumf %158, %161 : vector<8x32xf32>
    %163 = math.exp %162 : vector<8x32xf32>
    %cst_76 = arith.constant 1.000000e+00 : f32
    %164 = vector.broadcast %cst_76 : f32 to vector<8x32xf32>
    %165 = arith.subf %163, %164 : vector<8x32xf32>
    %166 = arith.select %160, %158, %165 : vector<8x32xi1>, vector<8x32xf32>
    %167 = arith.truncf %166 : vector<8x32xf32> to vector<8x32xbf16>
    %cst_77 = arith.constant dense<0.000000e+00> : vector<8x32xf32>
    %168 = tpu.matmul %167, %7, %cst_77 {dimension_numbers = #tpu.dot_dimension_numbers<[1], [0], [0], [1], [0, 0, 1, 1], [], []>} : vector<8x32xbf16>, vector<32x32xbf16>, vector<8x32xf32> -> vector<8x32xf32>
    %169 = arith.addf %168, %31 : vector<8x32xf32>
    %cst_78 = arith.constant 0.000000e+00 : f32
    %170 = vector.broadcast %cst_78 : f32 to vector<8x32xf32>
    %171 = arith.cmpf ogt, %169, %170 : vector<8x32xf32>
    %cst_79 = arith.constant 0.000000e+00 : f32
    %172 = vector.broadcast %cst_79 : f32 to vector<8x32xf32>
    %173 = arith.minimumf %169, %172 : vector<8x32xf32>
    %174 = math.exp %173 : vector<8x32xf32>
    %cst_80 = arith.constant 1.000000e+00 : f32
    %175 = vector.broadcast %cst_80 : f32 to vector<8x32xf32>
    %176 = arith.subf %174, %175 : vector<8x32xf32>
    %177 = arith.select %171, %169, %176 : vector<8x32xi1>, vector<8x32xf32>
    %178 = arith.truncf %177 : vector<8x32xf32> to vector<8x32xbf16>
    %cst_81 = arith.constant dense<0.000000e+00> : vector<8x32xf32>
    %179 = tpu.matmul %178, %8, %cst_81 {dimension_numbers = #tpu.dot_dimension_numbers<[1], [0], [0], [1], [0, 0, 1, 1], [], []>} : vector<8x32xbf16>, vector<32x32xbf16>, vector<8x32xf32> -> vector<8x32xf32>
    %180 = arith.addf %179, %34 : vector<8x32xf32>
    %181 = arith.subf %180, %51 : vector<8x32xf32>
    %182 = arith.mulf %181, %181 : vector<8x32xf32>
    %183 = vector.extract_strided_slice %166 {offsets = [0, 0], sizes = [2, 32], strides = [1, 1]} : vector<8x32xf32> to vector<2x32xf32>
    %184 = vector.extract_strided_slice %166 {offsets = [2, 0], sizes = [2, 32], strides = [1, 1]} : vector<8x32xf32> to vector<2x32xf32>
    %185 = arith.maximumf %183, %184 : vector<2x32xf32>
    %c0_82 = arith.constant 0 : index
    %c32_83 = arith.constant 32 : index
    %186 = vector.load %arg4[%c0_82, %c32_83] : memref<4x96xf32, #tpu.memory_space<vmem>>, vector<2x32xf32>
    tpu.vector_store %arg4[%c0_82, %c32_83], %185 {strides = array<i32>} : memref<4x96xf32, #tpu.memory_space<vmem>>, vector<2x32xf32>,
    %187 = vector.extract_strided_slice %166 {offsets = [4, 0], sizes = [2, 32], strides = [1, 1]} : vector<8x32xf32> to vector<2x32xf32>
    %188 = vector.extract_strided_slice %166 {offsets = [6, 0], sizes = [2, 32], strides = [1, 1]} : vector<8x32xf32> to vector<2x32xf32>
    %189 = arith.maximumf %187, %188 : vector<2x32xf32>
    %c2_84 = arith.constant 2 : index
    %c32_85 = arith.constant 32 : index
    %190 = vector.load %arg4[%c2_84, %c32_85] : memref<4x96xf32, #tpu.memory_space<vmem>>, vector<2x32xf32>
    tpu.vector_store %arg4[%c2_84, %c32_85], %189 {strides = array<i32>} : memref<4x96xf32, #tpu.memory_space<vmem>>, vector<2x32xf32>,
    %c0_86 = arith.constant 0 : index
    %c0_87 = arith.constant 0 : index
    %191 = vector.load %arg4[%c0_86, %c0_87] : memref<4x96xf32, #tpu.memory_space<vmem>>, vector<4x96xf32>
    %192 = arith.truncf %191 : vector<4x96xf32> to vector<4x96xbf16>
    %cst_88 = arith.constant dense<0.000000e+00> : vector<4x96xf32>
    %193 = tpu.matmul %192, %9, %cst_88 {dimension_numbers = #tpu.dot_dimension_numbers<[1], [0], [0], [1], [0, 0, 1, 1], [], []>} : vector<4x96xbf16>, vector<96x96xbf16>, vector<4x96xf32> -> vector<4x96xf32>
    %194 = arith.addf %193, %37 : vector<4x96xf32>
    %195 = arith.truncf %68 : vector<4x32xf32> to vector<4x32xbf16>
    %cst_89 = arith.constant dense<0.000000e+00> : vector<4x96xf32>
    %196 = tpu.matmul %195, %10, %cst_89 {dimension_numbers = #tpu.dot_dimension_numbers<[1], [0], [0], [1], [0, 0, 1, 1], [], []>} : vector<4x32xbf16>, vector<32x96xbf16>, vector<4x96xf32> -> vector<4x96xf32>
    %197 = arith.addf %196, %40 : vector<4x96xf32>
    %198 = vector.extract_strided_slice %194 {offsets = [0, 0], sizes = [4, 32], strides = [1, 1]} : vector<4x96xf32> to vector<4x32xf32>
    %199 = vector.extract_strided_slice %197 {offsets = [0, 0], sizes = [4, 32], strides = [1, 1]} : vector<4x96xf32> to vector<4x32xf32>
    %200 = arith.addf %198, %199 : vector<4x32xf32>
    %cst_90 = arith.constant 0.000000e+00 : f32
    %201 = vector.broadcast %cst_90 : f32 to vector<4x32xf32>
    %202 = arith.subf %201, %200 : vector<4x32xf32>
    %203 = math.exp %202 : vector<4x32xf32>
    %cst_91 = arith.constant 1.000000e+00 : f32
    %204 = vector.broadcast %cst_91 : f32 to vector<4x32xf32>
    %205 = arith.addf %204, %203 : vector<4x32xf32>
    %cst_92 = arith.constant 1.000000e+00 : f32
    %206 = vector.broadcast %cst_92 : f32 to vector<4x32xf32>
    %207 = arith.divf %206, %205 : vector<4x32xf32>
    %208 = vector.extract_strided_slice %194 {offsets = [0, 32], sizes = [4, 32], strides = [1, 1]} : vector<4x96xf32> to vector<4x32xf32>
    %209 = vector.extract_strided_slice %197 {offsets = [0, 32], sizes = [4, 32], strides = [1, 1]} : vector<4x96xf32> to vector<4x32xf32>
    %210 = arith.addf %208, %209 : vector<4x32xf32>
    %cst_93 = arith.constant 0.000000e+00 : f32
    %211 = vector.broadcast %cst_93 : f32 to vector<4x32xf32>
    %212 = arith.subf %211, %210 : vector<4x32xf32>
    %213 = math.exp %212 : vector<4x32xf32>
    %cst_94 = arith.constant 1.000000e+00 : f32
    %214 = vector.broadcast %cst_94 : f32 to vector<4x32xf32>
    %215 = arith.addf %214, %213 : vector<4x32xf32>
    %cst_95 = arith.constant 1.000000e+00 : f32
    %216 = vector.broadcast %cst_95 : f32 to vector<4x32xf32>
    %217 = arith.divf %216, %215 : vector<4x32xf32>
    %218 = vector.extract_strided_slice %194 {offsets = [0, 64], sizes = [4, 32], strides = [1, 1]} : vector<4x96xf32> to vector<4x32xf32>
    %219 = vector.extract_strided_slice %197 {offsets = [0, 64], sizes = [4, 32], strides = [1, 1]} : vector<4x96xf32> to vector<4x32xf32>
    %220 = arith.mulf %207, %219 : vector<4x32xf32>
    %221 = arith.addf %218, %220 : vector<4x32xf32>
    %222 = math.tanh %221 : vector<4x32xf32>
    %cst_96 = arith.constant 1.000000e+00 : f32
    %223 = vector.broadcast %cst_96 : f32 to vector<4x32xf32>
    %224 = arith.subf %223, %217 : vector<4x32xf32>
    %225 = arith.mulf %224, %222 : vector<4x32xf32>
    %226 = arith.mulf %217, %68 : vector<4x32xf32>
    %227 = arith.addf %225, %226 : vector<4x32xf32>
    %228 = arith.truncf %227 : vector<4x32xf32> to vector<4x32xbf16>
    %cst_97 = arith.constant dense<0.000000e+00> : vector<4x32xf32>
    %229 = tpu.matmul %228, %11, %cst_97 {dimension_numbers = #tpu.dot_dimension_numbers<[1], [0], [0], [1], [0, 0, 1, 1], [], []>} : vector<4x32xbf16>, vector<32x32xbf16>, vector<4x32xf32> -> vector<4x32xf32>
    %230 = arith.addf %229, %43 : vector<4x32xf32>
    %cst_98 = arith.constant 0.000000e+00 : f32
    %231 = vector.broadcast %cst_98 : f32 to vector<4x32xf32>
    %232 = arith.cmpf ogt, %230, %231 : vector<4x32xf32>
    %cst_99 = arith.constant 0.000000e+00 : f32
    %233 = vector.broadcast %cst_99 : f32 to vector<4x32xf32>
    %234 = arith.minimumf %230, %233 : vector<4x32xf32>
    %235 = math.exp %234 : vector<4x32xf32>
    %cst_100 = arith.constant 1.000000e+00 : f32
    %236 = vector.broadcast %cst_100 : f32 to vector<4x32xf32>
    %237 = arith.subf %235, %236 : vector<4x32xf32>
    %238 = arith.select %232, %230, %237 : vector<4x32xi1>, vector<4x32xf32>
    %239 = arith.truncf %238 : vector<4x32xf32> to vector<4x32xbf16>
    %cst_101 = arith.constant dense<0.000000e+00> : vector<4x64xf32>
    %240 = tpu.matmul %239, %12, %cst_101 {dimension_numbers = #tpu.dot_dimension_numbers<[1], [0], [0], [1], [0, 0, 1, 1], [], []>} : vector<4x32xbf16>, vector<32x64xbf16>, vector<4x64xf32> -> vector<4x64xf32>
    %241 = arith.addf %240, %46 : vector<4x64xf32>
    %cst_102 = arith.constant 0.000000e+00 : f32
    %242 = vector.broadcast %cst_102 : f32 to vector<4x64xf32>
    %243 = arith.cmpf ogt, %241, %242 : vector<4x64xf32>
    %cst_103 = arith.constant 0.000000e+00 : f32
    %244 = vector.broadcast %cst_103 : f32 to vector<4x64xf32>
    %245 = arith.minimumf %241, %244 : vector<4x64xf32>
    %246 = math.exp %245 : vector<4x64xf32>
    %cst_104 = arith.constant 1.000000e+00 : f32
    %247 = vector.broadcast %cst_104 : f32 to vector<4x64xf32>
    %248 = arith.subf %246, %247 : vector<4x64xf32>
    %249 = arith.select %243, %241, %248 : vector<4x64xi1>, vector<4x64xf32>
    %250 = arith.truncf %249 : vector<4x64xf32> to vector<4x64xbf16>
    %cst_105 = arith.constant dense<0.000000e+00> : vector<4x10xf32>
    %251 = tpu.matmul %250, %13, %cst_105 {dimension_numbers = #tpu.dot_dimension_numbers<[1], [0], [0], [1], [0, 0, 1, 1], [], []>} : vector<4x64xbf16>, vector<64x10xbf16>, vector<4x10xf32> -> vector<4x10xf32>
    %252 = arith.addf %251, %49 : vector<4x10xf32>
    %253 = vector.extract_strided_slice %252 {offsets = [0, 0], sizes = [4, 2], strides = [1, 1]} : vector<4x10xf32> to vector<4x2xf32>
    %254 = math.tanh %253 : vector<4x2xf32>
    %cst_106 = arith.constant 2.000000e-02 : f32
    %255 = vector.broadcast %cst_106 : f32 to vector<4x2xf32>
    %256 = arith.mulf %254, %255 : vector<4x2xf32>
    %cst_107 = arith.constant 0.00999999977 : f32
    %257 = vector.broadcast %cst_107 : f32 to vector<4x2xf32>
    %258 = arith.subf %256, %257 : vector<4x2xf32>
    %259 = vector.extract_strided_slice %252 {offsets = [0, 2], sizes = [4, 8], strides = [1, 1]} : vector<4x10xf32> to vector<4x8xf32>
    %cst_108 = arith.constant dense<0xFF800000> : vector<4xf32>
    %260 = vector.multi_reduction <maximumf>, %259, %cst_108 [1] : vector<4x8xf32> to vector<4xf32>
    %261 = vector.shape_cast %260 : vector<4xf32> to vector<4x1xf32>
    %262 = vector.broadcast %261 : vector<4x1xf32> to vector<4x8xf32>
    %263 = arith.subf %259, %262 : vector<4x8xf32>
    %264 = math.exp %263 : vector<4x8xf32>
    %cst_109 = arith.constant dense<0.000000e+00> : vector<4xf32>
    %265 = vector.multi_reduction <add>, %264, %cst_109 [1] : vector<4x8xf32> to vector<4xf32>
    %266 = vector.shape_cast %265 : vector<4xf32> to vector<4x1xf32>
    %267 = tpu.reciprocal %266 {approx = true} : vector<4x1xf32> -> vector<4x1xf32>
    %268 = vector.broadcast %267 : vector<4x1xf32> to vector<4x8xf32>
    %269 = arith.mulf %264, %268 : vector<4x8xf32>
    %270 = arith.addf %53, %258 : vector<4x2xf32>
    %271 = arith.subf %270, %52 : vector<4x2xf32>
    %272 = arith.mulf %271, %271 : vector<4x2xf32>
    %273 = vector.shape_cast %182 : vector<8x32xf32> to vector<1x8x32xf32>
    %cst_110 = arith.constant dense<0.000000e+00> : vector<1xf32>
    %274 = vector.multi_reduction <add>, %273, %cst_110 [1, 2] : vector<1x8x32xf32> to vector<1xf32>
    %275 = vector.shape_cast %274 : vector<1xf32> to vector<1x1x1xf32>
    %276 = vector.extract %275[0, 0, 0] : f32 from vector<1x1x1xf32>
    %277 = vector.broadcast %276 : f32 to vector<1x1xf32>
    %278 = vector.shape_cast %272 : vector<4x2xf32> to vector<1x4x2xf32>
    %cst_111 = arith.constant dense<0.000000e+00> : vector<1xf32>
    %279 = vector.multi_reduction <add>, %278, %cst_111 [1, 2] : vector<1x4x2xf32> to vector<1xf32>
    %280 = vector.shape_cast %279 : vector<1xf32> to vector<1x1x1xf32>
    %281 = vector.extract %280[0, 0, 0] : f32 from vector<1x1x1xf32>
    %282 = vector.broadcast %281 : f32 to vector<1x1xf32>
    %283 = arith.addf %277, %282 : vector<1x1xf32>
    %284 = vector.shape_cast %269 : vector<4x8xf32> to vector<1x4x8xf32>
    %cst_112 = arith.constant dense<0.000000e+00> : vector<1xf32>
    %285 = vector.multi_reduction <add>, %284, %cst_112 [1, 2] : vector<1x4x8xf32> to vector<1xf32>
    %286 = vector.shape_cast %285 : vector<1xf32> to vector<1x1x1xf32>
    %287 = vector.extract %286[0, 0, 0] : f32 from vector<1x1x1xf32>
    %288 = vector.broadcast %287 : f32 to vector<1x1xf32>
    %289 = tpu.reciprocal %288 {approx = true} : vector<1x1xf32> -> vector<1x1xf32>
    %290 = vector.broadcast %289 : vector<1x1xf32> to vector<4x8xf32>
    %291 = arith.mulf %269, %290 : vector<4x8xf32>
    %cst_113 = arith.constant 9.99999968E-21 : f32
    %292 = vector.broadcast %cst_113 : f32 to vector<4x8xf32>
    %293 = arith.addf %291, %292 : vector<4x8xf32>
    %294 = math.log %293 : vector<4x8xf32>
    %295 = arith.mulf %291, %294 : vector<4x8xf32>
    %296 = vector.shape_cast %295 : vector<4x8xf32> to vector<1x4x8xf32>
    %cst_114 = arith.constant dense<0.000000e+00> : vector<1xf32>
    %297 = vector.multi_reduction <add>, %296, %cst_114 [1, 2] : vector<1x4x8xf32> to vector<1xf32>
    %298 = vector.shape_cast %297 : vector<1xf32> to vector<1x1x1xf32>
    %299 = vector.extract %298[0, 0, 0] : f32 from vector<1x1x1xf32>
    %300 = vector.broadcast %299 : f32 to vector<1x1xf32>
    %cst_115 = arith.constant 0.000000e+00 : f32
    %301 = vector.broadcast %cst_115 : f32 to vector<1x1xf32>
    %302 = arith.subf %301, %300 : vector<1x1xf32>
    %cst_116 = arith.constant 1.000000e-03 : f32
    %303 = vector.broadcast %cst_116 : f32 to vector<1x1xf32>
    %304 = arith.mulf %302, %303 : vector<1x1xf32>
    %c0_117 = arith.constant 0 : index
    %c0_118 = arith.constant 0 : index
    %c0_119 = arith.constant 0 : index
    %305 = vector.load %arg3[%c0_117, %c0_118, %c0_119] : memref<2x4x128xf32, #tpu.memory_space<vmem>>, vector<1x4x2xf32>
    %306 = vector.shape_cast %305 : vector<1x4x2xf32> to vector<4x2xf32>
    %307 = vector.shape_cast %270 : vector<4x2xf32> to vector<1x4x2xf32>
    tpu.vector_store %arg3[%c0_117, %c0_118, %c0_119], %307 {strides = array<i32>} : memref<2x4x128xf32, #tpu.memory_space<vmem>>, vector<1x4x2xf32>,
    %c0_120 = arith.constant 0 : index
    %c0_121 = arith.constant 0 : index
    %c2_122 = arith.constant 2 : index
    %308 = vector.load %arg3[%c0_120, %c0_121, %c2_122] : memref<2x4x128xf32, #tpu.memory_space<vmem>>, vector<1x4x8xf32>
    %309 = vector.shape_cast %308 : vector<1x4x8xf32> to vector<4x8xf32>
    %310 = vector.shape_cast %269 : vector<4x8xf32> to vector<1x4x8xf32>
    tpu.vector_store %arg3[%c0_120, %c0_121, %c2_122], %310 {strides = array<i32>} : memref<2x4x128xf32, #tpu.memory_space<vmem>>, vector<1x4x8xf32>,
    %311 = vector.shape_cast %283 : vector<1x1xf32> to vector<1x1xf32>
    %312 = vector.broadcast %311 : vector<1x1xf32> to vector<4x1xf32>
    %c0_123 = arith.constant 0 : index
    %c0_124 = arith.constant 0 : index
    %c10_125 = arith.constant 10 : index
    %313 = vector.load %arg3[%c0_123, %c0_124, %c10_125] : memref<2x4x128xf32, #tpu.memory_space<vmem>>, vector<1x4x1xf32>
    %314 = vector.shape_cast %313 : vector<1x4x1xf32> to vector<4x1xf32>
    %315 = vector.shape_cast %312 : vector<4x1xf32> to vector<1x4x1xf32>
    tpu.vector_store %arg3[%c0_123, %c0_124, %c10_125], %315 {strides = array<i32>} : memref<2x4x128xf32, #tpu.memory_space<vmem>>, vector<1x4x1xf32>,
    %316 = vector.shape_cast %304 : vector<1x1xf32> to vector<1x1xf32>
    %317 = vector.broadcast %316 : vector<1x1xf32> to vector<4x1xf32>
    %c0_126 = arith.constant 0 : index
    %c0_127 = arith.constant 0 : index
    %c11_128 = arith.constant 11 : index
    %318 = vector.load %arg3[%c0_126, %c0_127, %c11_128] : memref<2x4x128xf32, #tpu.memory_space<vmem>>, vector<1x4x1xf32>
    %319 = vector.shape_cast %318 : vector<1x4x1xf32> to vector<4x1xf32>
    %320 = vector.shape_cast %317 : vector<4x1xf32> to vector<1x4x1xf32>
    tpu.vector_store %arg3[%c0_126, %c0_127, %c11_128], %320 {strides = array<i32>} : memref<2x4x128xf32, #tpu.memory_space<vmem>>, vector<1x4x1xf32>,
    %c0_129 = arith.constant 0 : index
    %c0_130 = arith.constant 0 : index
    %321 = vector.load %arg5[%c0_129, %c0_130] : memref<8x8xf32, #tpu.memory_space<vmem>>, vector<4x8xf32>
    tpu.vector_store %arg5[%c0_129, %c0_130], %269 {strides = array<i32>} : memref<8x8xf32, #tpu.memory_space<vmem>>, vector<4x8xf32>,
    %c4_131 = arith.constant 4 : index
    %c0_132 = arith.constant 0 : index
    %322 = vector.load %arg5[%c4_131, %c0_132] : memref<8x8xf32, #tpu.memory_space<vmem>>, vector<4x8xf32>
    tpu.vector_store %arg5[%c4_131, %c0_132], %269 {strides = array<i32>} : memref<8x8xf32, #tpu.memory_space<vmem>>, vector<4x8xf32>,
    %323 = arith.truncf %101 : vector<12x32xf32> to vector<12x32xbf16>
    %cst_133 = arith.constant dense<0.000000e+00> : vector<12x96xf32>
    %324 = tpu.matmul %323, %2, %cst_133 {dimension_numbers = #tpu.dot_dimension_numbers<[1], [0], [0], [1], [0, 0, 1, 1], [], []>} : vector<12x32xbf16>, vector<32x96xbf16>, vector<12x96xf32> -> vector<12x96xf32>
    %325 = arith.addf %324, %16 : vector<12x96xf32>
    %326 = vector.extract_strided_slice %61 {offsets = [0, 0], sizes = [12, 32], strides = [1, 1]} : vector<12x96xf32> to vector<12x32xf32>
    %327 = vector.extract_strided_slice %325 {offsets = [0, 0], sizes = [12, 32], strides = [1, 1]} : vector<12x96xf32> to vector<12x32xf32>
    %328 = arith.addf %326, %327 : vector<12x32xf32>
    %cst_134 = arith.constant 0.000000e+00 : f32
    %329 = vector.broadcast %cst_134 : f32 to vector<12x32xf32>
    %330 = arith.subf %329, %328 : vector<12x32xf32>
    %331 = math.exp %330 : vector<12x32xf32>
    %cst_135 = arith.constant 1.000000e+00 : f32
    %332 = vector.broadcast %cst_135 : f32 to vector<12x32xf32>
    %333 = arith.addf %332, %331 : vector<12x32xf32>
    %cst_136 = arith.constant 1.000000e+00 : f32
    %334 = vector.broadcast %cst_136 : f32 to vector<12x32xf32>
    %335 = arith.divf %334, %333 : vector<12x32xf32>
    %336 = vector.extract_strided_slice %61 {offsets = [0, 32], sizes = [12, 32], strides = [1, 1]} : vector<12x96xf32> to vector<12x32xf32>
    %337 = vector.extract_strided_slice %325 {offsets = [0, 32], sizes = [12, 32], strides = [1, 1]} : vector<12x96xf32> to vector<12x32xf32>
    %338 = arith.addf %336, %337 : vector<12x32xf32>
    %cst_137 = arith.constant 0.000000e+00 : f32
    %339 = vector.broadcast %cst_137 : f32 to vector<12x32xf32>
    %340 = arith.subf %339, %338 : vector<12x32xf32>
    %341 = math.exp %340 : vector<12x32xf32>
    %cst_138 = arith.constant 1.000000e+00 : f32
    %342 = vector.broadcast %cst_138 : f32 to vector<12x32xf32>
    %343 = arith.addf %342, %341 : vector<12x32xf32>
    %cst_139 = arith.constant 1.000000e+00 : f32
    %344 = vector.broadcast %cst_139 : f32 to vector<12x32xf32>
    %345 = arith.divf %344, %343 : vector<12x32xf32>
    %346 = vector.extract_strided_slice %61 {offsets = [0, 64], sizes = [12, 32], strides = [1, 1]} : vector<12x96xf32> to vector<12x32xf32>
    %347 = vector.extract_strided_slice %325 {offsets = [0, 64], sizes = [12, 32], strides = [1, 1]} : vector<12x96xf32> to vector<12x32xf32>
    %348 = arith.mulf %335, %347 : vector<12x32xf32>
    %349 = arith.addf %346, %348 : vector<12x32xf32>
    %350 = math.tanh %349 : vector<12x32xf32>
    %cst_140 = arith.constant 1.000000e+00 : f32
    %351 = vector.broadcast %cst_140 : f32 to vector<12x32xf32>
    %352 = arith.subf %351, %345 : vector<12x32xf32>
    %353 = arith.mulf %352, %350 : vector<12x32xf32>
    %354 = arith.mulf %345, %101 : vector<12x32xf32>
    %355 = arith.addf %353, %354 : vector<12x32xf32>
    %356 = arith.truncf %355 : vector<12x32xf32> to vector<12x32xbf16>
    %cst_141 = arith.constant dense<0.000000e+00> : vector<12x32xf32>
    %357 = tpu.matmul %356, %3, %cst_141 {dimension_numbers = #tpu.dot_dimension_numbers<[1], [0], [0], [1], [0, 0, 1, 1], [], []>} : vector<12x32xbf16>, vector<32x32xbf16>, vector<12x32xf32> -> vector<12x32xf32>
    %358 = arith.addf %357, %19 : vector<12x32xf32>
    %cst_142 = arith.constant 0.000000e+00 : f32
    %359 = vector.broadcast %cst_142 : f32 to vector<12x32xf32>
    %360 = arith.cmpf ogt, %358, %359 : vector<12x32xf32>
    %cst_143 = arith.constant 0.000000e+00 : f32
    %361 = vector.broadcast %cst_143 : f32 to vector<12x32xf32>
    %362 = arith.minimumf %358, %361 : vector<12x32xf32>
    %363 = math.exp %362 : vector<12x32xf32>
    %cst_144 = arith.constant 1.000000e+00 : f32
    %364 = vector.broadcast %cst_144 : f32 to vector<12x32xf32>
    %365 = arith.subf %363, %364 : vector<12x32xf32>
    %366 = arith.select %360, %358, %365 : vector<12x32xi1>, vector<12x32xf32>
    %367 = vector.extract_strided_slice %366 {offsets = [0, 0], sizes = [4, 32], strides = [1, 1]} : vector<12x32xf32> to vector<4x32xf32>
    %368 = vector.extract_strided_slice %366 {offsets = [4, 0], sizes = [4, 32], strides = [1, 1]} : vector<12x32xf32> to vector<4x32xf32>
    %369 = arith.maximumf %367, %368 : vector<4x32xf32>
    %370 = vector.extract_strided_slice %366 {offsets = [8, 0], sizes = [4, 32], strides = [1, 1]} : vector<12x32xf32> to vector<4x32xf32>
    %371 = arith.maximumf %369, %370 : vector<4x32xf32>
    %c0_145 = arith.constant 0 : index
    %c0_146 = arith.constant 0 : index
    %372 = vector.load %arg4[%c0_145, %c0_146] : memref<4x96xf32, #tpu.memory_space<vmem>>, vector<4x32xf32>
    tpu.vector_store %arg4[%c0_145, %c0_146], %371 {strides = array<i32>} : memref<4x96xf32, #tpu.memory_space<vmem>>, vector<4x32xf32>,
    %c0_147 = arith.constant 0 : index
    %c0_148 = arith.constant 0 : index
    %373 = vector.load %arg5[%c0_147, %c0_148] : memref<8x8xf32, #tpu.memory_space<vmem>>, vector<8x8xf32>
    %374 = arith.truncf %373 : vector<8x8xf32> to vector<8x8xbf16>
    %cst_149 = arith.constant dense<0.000000e+00> : vector<8x96xf32>
    %375 = tpu.matmul %374, %4, %cst_149 {dimension_numbers = #tpu.dot_dimension_numbers<[1], [0], [0], [1], [0, 0, 1, 1], [], []>} : vector<8x8xbf16>, vector<8x96xbf16>, vector<8x96xf32> -> vector<8x96xf32>
    %376 = arith.addf %375, %22 : vector<8x96xf32>
    %377 = arith.truncf %155 : vector<8x32xf32> to vector<8x32xbf16>
    %cst_150 = arith.constant dense<0.000000e+00> : vector<8x96xf32>
    %378 = tpu.matmul %377, %5, %cst_150 {dimension_numbers = #tpu.dot_dimension_numbers<[1], [0], [0], [1], [0, 0, 1, 1], [], []>} : vector<8x32xbf16>, vector<32x96xbf16>, vector<8x96xf32> -> vector<8x96xf32>
    %379 = arith.addf %378, %25 : vector<8x96xf32>
    %380 = vector.extract_strided_slice %376 {offsets = [0, 0], sizes = [8, 32], strides = [1, 1]} : vector<8x96xf32> to vector<8x32xf32>
    %381 = vector.extract_strided_slice %379 {offsets = [0, 0], sizes = [8, 32], strides = [1, 1]} : vector<8x96xf32> to vector<8x32xf32>
    %382 = arith.addf %380, %381 : vector<8x32xf32>
    %cst_151 = arith.constant 0.000000e+00 : f32
    %383 = vector.broadcast %cst_151 : f32 to vector<8x32xf32>
    %384 = arith.subf %383, %382 : vector<8x32xf32>
    %385 = math.exp %384 : vector<8x32xf32>
    %cst_152 = arith.constant 1.000000e+00 : f32
    %386 = vector.broadcast %cst_152 : f32 to vector<8x32xf32>
    %387 = arith.addf %386, %385 : vector<8x32xf32>
    %cst_153 = arith.constant 1.000000e+00 : f32
    %388 = vector.broadcast %cst_153 : f32 to vector<8x32xf32>
    %389 = arith.divf %388, %387 : vector<8x32xf32>
    %390 = vector.extract_strided_slice %376 {offsets = [0, 32], sizes = [8, 32], strides = [1, 1]} : vector<8x96xf32> to vector<8x32xf32>
    %391 = vector.extract_strided_slice %379 {offsets = [0, 32], sizes = [8, 32], strides = [1, 1]} : vector<8x96xf32> to vector<8x32xf32>
    %392 = arith.addf %390, %391 : vector<8x32xf32>
    %cst_154 = arith.constant 0.000000e+00 : f32
    %393 = vector.broadcast %cst_154 : f32 to vector<8x32xf32>
    %394 = arith.subf %393, %392 : vector<8x32xf32>
    %395 = math.exp %394 : vector<8x32xf32>
    %cst_155 = arith.constant 1.000000e+00 : f32
    %396 = vector.broadcast %cst_155 : f32 to vector<8x32xf32>
    %397 = arith.addf %396, %395 : vector<8x32xf32>
    %cst_156 = arith.constant 1.000000e+00 : f32
    %398 = vector.broadcast %cst_156 : f32 to vector<8x32xf32>
    %399 = arith.divf %398, %397 : vector<8x32xf32>
    %400 = vector.extract_strided_slice %376 {offsets = [0, 64], sizes = [8, 32], strides = [1, 1]} : vector<8x96xf32> to vector<8x32xf32>
    %401 = vector.extract_strided_slice %379 {offsets = [0, 64], sizes = [8, 32], strides = [1, 1]} : vector<8x96xf32> to vector<8x32xf32>
    %402 = arith.mulf %389, %401 : vector<8x32xf32>
    %403 = arith.addf %400, %402 : vector<8x32xf32>
    %404 = math.tanh %403 : vector<8x32xf32>
    %cst_157 = arith.constant 1.000000e+00 : f32
    %405 = vector.broadcast %cst_157 : f32 to vector<8x32xf32>
    %406 = arith.subf %405, %399 : vector<8x32xf32>
    %407 = arith.mulf %406, %404 : vector<8x32xf32>
    %408 = arith.mulf %399, %155 : vector<8x32xf32>
    %409 = arith.addf %407, %408 : vector<8x32xf32>
    %410 = arith.truncf %409 : vector<8x32xf32> to vector<8x32xbf16>
    %cst_158 = arith.constant dense<0.000000e+00> : vector<8x32xf32>
    %411 = tpu.matmul %410, %6, %cst_158 {dimension_numbers = #tpu.dot_dimension_numbers<[1], [0], [0], [1], [0, 0, 1, 1], [], []>} : vector<8x32xbf16>, vector<32x32xbf16>, vector<8x32xf32> -> vector<8x32xf32>
    %412 = arith.addf %411, %28 : vector<8x32xf32>
    %cst_159 = arith.constant 0.000000e+00 : f32
    %413 = vector.broadcast %cst_159 : f32 to vector<8x32xf32>
    %414 = arith.cmpf ogt, %412, %413 : vector<8x32xf32>
    %cst_160 = arith.constant 0.000000e+00 : f32
    %415 = vector.broadcast %cst_160 : f32 to vector<8x32xf32>
    %416 = arith.minimumf %412, %415 : vector<8x32xf32>
    %417 = math.exp %416 : vector<8x32xf32>
    %cst_161 = arith.constant 1.000000e+00 : f32
    %418 = vector.broadcast %cst_161 : f32 to vector<8x32xf32>
    %419 = arith.subf %417, %418 : vector<8x32xf32>
    %420 = arith.select %414, %412, %419 : vector<8x32xi1>, vector<8x32xf32>
    %421 = arith.truncf %420 : vector<8x32xf32> to vector<8x32xbf16>
    %cst_162 = arith.constant dense<0.000000e+00> : vector<8x32xf32>
    %422 = tpu.matmul %421, %7, %cst_162 {dimension_numbers = #tpu.dot_dimension_numbers<[1], [0], [0], [1], [0, 0, 1, 1], [], []>} : vector<8x32xbf16>, vector<32x32xbf16>, vector<8x32xf32> -> vector<8x32xf32>
    %423 = arith.addf %422, %31 : vector<8x32xf32>
    %cst_163 = arith.constant 0.000000e+00 : f32
    %424 = vector.broadcast %cst_163 : f32 to vector<8x32xf32>
    %425 = arith.cmpf ogt, %423, %424 : vector<8x32xf32>
    %cst_164 = arith.constant 0.000000e+00 : f32
    %426 = vector.broadcast %cst_164 : f32 to vector<8x32xf32>
    %427 = arith.minimumf %423, %426 : vector<8x32xf32>
    %428 = math.exp %427 : vector<8x32xf32>
    %cst_165 = arith.constant 1.000000e+00 : f32
    %429 = vector.broadcast %cst_165 : f32 to vector<8x32xf32>
    %430 = arith.subf %428, %429 : vector<8x32xf32>
    %431 = arith.select %425, %423, %430 : vector<8x32xi1>, vector<8x32xf32>
    %432 = arith.truncf %431 : vector<8x32xf32> to vector<8x32xbf16>
    %cst_166 = arith.constant dense<0.000000e+00> : vector<8x32xf32>
    %433 = tpu.matmul %432, %8, %cst_166 {dimension_numbers = #tpu.dot_dimension_numbers<[1], [0], [0], [1], [0, 0, 1, 1], [], []>} : vector<8x32xbf16>, vector<32x32xbf16>, vector<8x32xf32> -> vector<8x32xf32>
    %434 = arith.addf %433, %34 : vector<8x32xf32>
    %435 = arith.subf %434, %51 : vector<8x32xf32>
    %436 = arith.mulf %435, %435 : vector<8x32xf32>
    %437 = vector.extract_strided_slice %420 {offsets = [0, 0], sizes = [2, 32], strides = [1, 1]} : vector<8x32xf32> to vector<2x32xf32>
    %438 = vector.extract_strided_slice %420 {offsets = [2, 0], sizes = [2, 32], strides = [1, 1]} : vector<8x32xf32> to vector<2x32xf32>
    %439 = arith.maximumf %437, %438 : vector<2x32xf32>
    %c0_167 = arith.constant 0 : index
    %c32_168 = arith.constant 32 : index
    %440 = vector.load %arg4[%c0_167, %c32_168] : memref<4x96xf32, #tpu.memory_space<vmem>>, vector<2x32xf32>
    tpu.vector_store %arg4[%c0_167, %c32_168], %439 {strides = array<i32>} : memref<4x96xf32, #tpu.memory_space<vmem>>, vector<2x32xf32>,
    %441 = vector.extract_strided_slice %420 {offsets = [4, 0], sizes = [2, 32], strides = [1, 1]} : vector<8x32xf32> to vector<2x32xf32>
    %442 = vector.extract_strided_slice %420 {offsets = [6, 0], sizes = [2, 32], strides = [1, 1]} : vector<8x32xf32> to vector<2x32xf32>
    %443 = arith.maximumf %441, %442 : vector<2x32xf32>
    %c2_169 = arith.constant 2 : index
    %c32_170 = arith.constant 32 : index
    %444 = vector.load %arg4[%c2_169, %c32_170] : memref<4x96xf32, #tpu.memory_space<vmem>>, vector<2x32xf32>
    tpu.vector_store %arg4[%c2_169, %c32_170], %443 {strides = array<i32>} : memref<4x96xf32, #tpu.memory_space<vmem>>, vector<2x32xf32>,
    %c0_171 = arith.constant 0 : index
    %c0_172 = arith.constant 0 : index
    %445 = vector.load %arg4[%c0_171, %c0_172] : memref<4x96xf32, #tpu.memory_space<vmem>>, vector<4x96xf32>
    %446 = arith.truncf %445 : vector<4x96xf32> to vector<4x96xbf16>
    %cst_173 = arith.constant dense<0.000000e+00> : vector<4x96xf32>
    %447 = tpu.matmul %446, %9, %cst_173 {dimension_numbers = #tpu.dot_dimension_numbers<[1], [0], [0], [1], [0, 0, 1, 1], [], []>} : vector<4x96xbf16>, vector<96x96xbf16>, vector<4x96xf32> -> vector<4x96xf32>
    %448 = arith.addf %447, %37 : vector<4x96xf32>
    %449 = arith.truncf %227 : vector<4x32xf32> to vector<4x32xbf16>
    %cst_174 = arith.constant dense<0.000000e+00> : vector<4x96xf32>
    %450 = tpu.matmul %449, %10, %cst_174 {dimension_numbers = #tpu.dot_dimension_numbers<[1], [0], [0], [1], [0, 0, 1, 1], [], []>} : vector<4x32xbf16>, vector<32x96xbf16>, vector<4x96xf32> -> vector<4x96xf32>
    %451 = arith.addf %450, %40 : vector<4x96xf32>
    %452 = vector.extract_strided_slice %448 {offsets = [0, 0], sizes = [4, 32], strides = [1, 1]} : vector<4x96xf32> to vector<4x32xf32>
    %453 = vector.extract_strided_slice %451 {offsets = [0, 0], sizes = [4, 32], strides = [1, 1]} : vector<4x96xf32> to vector<4x32xf32>
    %454 = arith.addf %452, %453 : vector<4x32xf32>
    %cst_175 = arith.constant 0.000000e+00 : f32
    %455 = vector.broadcast %cst_175 : f32 to vector<4x32xf32>
    %456 = arith.subf %455, %454 : vector<4x32xf32>
    %457 = math.exp %456 : vector<4x32xf32>
    %cst_176 = arith.constant 1.000000e+00 : f32
    %458 = vector.broadcast %cst_176 : f32 to vector<4x32xf32>
    %459 = arith.addf %458, %457 : vector<4x32xf32>
    %cst_177 = arith.constant 1.000000e+00 : f32
    %460 = vector.broadcast %cst_177 : f32 to vector<4x32xf32>
    %461 = arith.divf %460, %459 : vector<4x32xf32>
    %462 = vector.extract_strided_slice %448 {offsets = [0, 32], sizes = [4, 32], strides = [1, 1]} : vector<4x96xf32> to vector<4x32xf32>
    %463 = vector.extract_strided_slice %451 {offsets = [0, 32], sizes = [4, 32], strides = [1, 1]} : vector<4x96xf32> to vector<4x32xf32>
    %464 = arith.addf %462, %463 : vector<4x32xf32>
    %cst_178 = arith.constant 0.000000e+00 : f32
    %465 = vector.broadcast %cst_178 : f32 to vector<4x32xf32>
    %466 = arith.subf %465, %464 : vector<4x32xf32>
    %467 = math.exp %466 : vector<4x32xf32>
    %cst_179 = arith.constant 1.000000e+00 : f32
    %468 = vector.broadcast %cst_179 : f32 to vector<4x32xf32>
    %469 = arith.addf %468, %467 : vector<4x32xf32>
    %cst_180 = arith.constant 1.000000e+00 : f32
    %470 = vector.broadcast %cst_180 : f32 to vector<4x32xf32>
    %471 = arith.divf %470, %469 : vector<4x32xf32>
    %472 = vector.extract_strided_slice %448 {offsets = [0, 64], sizes = [4, 32], strides = [1, 1]} : vector<4x96xf32> to vector<4x32xf32>
    %473 = vector.extract_strided_slice %451 {offsets = [0, 64], sizes = [4, 32], strides = [1, 1]} : vector<4x96xf32> to vector<4x32xf32>
    %474 = arith.mulf %461, %473 : vector<4x32xf32>
    %475 = arith.addf %472, %474 : vector<4x32xf32>
    %476 = math.tanh %475 : vector<4x32xf32>
    %cst_181 = arith.constant 1.000000e+00 : f32
    %477 = vector.broadcast %cst_181 : f32 to vector<4x32xf32>
    %478 = arith.subf %477, %471 : vector<4x32xf32>
    %479 = arith.mulf %478, %476 : vector<4x32xf32>
    %480 = arith.mulf %471, %227 : vector<4x32xf32>
    %481 = arith.addf %479, %480 : vector<4x32xf32>
    %482 = arith.truncf %481 : vector<4x32xf32> to vector<4x32xbf16>
    %cst_182 = arith.constant dense<0.000000e+00> : vector<4x32xf32>
    %483 = tpu.matmul %482, %11, %cst_182 {dimension_numbers = #tpu.dot_dimension_numbers<[1], [0], [0], [1], [0, 0, 1, 1], [], []>} : vector<4x32xbf16>, vector<32x32xbf16>, vector<4x32xf32> -> vector<4x32xf32>
    %484 = arith.addf %483, %43 : vector<4x32xf32>
    %cst_183 = arith.constant 0.000000e+00 : f32
    %485 = vector.broadcast %cst_183 : f32 to vector<4x32xf32>
    %486 = arith.cmpf ogt, %484, %485 : vector<4x32xf32>
    %cst_184 = arith.constant 0.000000e+00 : f32
    %487 = vector.broadcast %cst_184 : f32 to vector<4x32xf32>
    %488 = arith.minimumf %484, %487 : vector<4x32xf32>
    %489 = math.exp %488 : vector<4x32xf32>
    %cst_185 = arith.constant 1.000000e+00 : f32
    %490 = vector.broadcast %cst_185 : f32 to vector<4x32xf32>
    %491 = arith.subf %489, %490 : vector<4x32xf32>
    %492 = arith.select %486, %484, %491 : vector<4x32xi1>, vector<4x32xf32>
    %493 = arith.truncf %492 : vector<4x32xf32> to vector<4x32xbf16>
    %cst_186 = arith.constant dense<0.000000e+00> : vector<4x64xf32>
    %494 = tpu.matmul %493, %12, %cst_186 {dimension_numbers = #tpu.dot_dimension_numbers<[1], [0], [0], [1], [0, 0, 1, 1], [], []>} : vector<4x32xbf16>, vector<32x64xbf16>, vector<4x64xf32> -> vector<4x64xf32>
    %495 = arith.addf %494, %46 : vector<4x64xf32>
    %cst_187 = arith.constant 0.000000e+00 : f32
    %496 = vector.broadcast %cst_187 : f32 to vector<4x64xf32>
    %497 = arith.cmpf ogt, %495, %496 : vector<4x64xf32>
    %cst_188 = arith.constant 0.000000e+00 : f32
    %498 = vector.broadcast %cst_188 : f32 to vector<4x64xf32>
    %499 = arith.minimumf %495, %498 : vector<4x64xf32>
    %500 = math.exp %499 : vector<4x64xf32>
    %cst_189 = arith.constant 1.000000e+00 : f32
    %501 = vector.broadcast %cst_189 : f32 to vector<4x64xf32>
    %502 = arith.subf %500, %501 : vector<4x64xf32>
    %503 = arith.select %497, %495, %502 : vector<4x64xi1>, vector<4x64xf32>
    %504 = arith.truncf %503 : vector<4x64xf32> to vector<4x64xbf16>
    %cst_190 = arith.constant dense<0.000000e+00> : vector<4x10xf32>
    %505 = tpu.matmul %504, %13, %cst_190 {dimension_numbers = #tpu.dot_dimension_numbers<[1], [0], [0], [1], [0, 0, 1, 1], [], []>} : vector<4x64xbf16>, vector<64x10xbf16>, vector<4x10xf32> -> vector<4x10xf32>
    %506 = arith.addf %505, %49 : vector<4x10xf32>
    %507 = vector.extract_strided_slice %506 {offsets = [0, 0], sizes = [4, 2], strides = [1, 1]} : vector<4x10xf32> to vector<4x2xf32>
    %508 = math.tanh %507 : vector<4x2xf32>
    %cst_191 = arith.constant 2.000000e-02 : f32
    %509 = vector.broadcast %cst_191 : f32 to vector<4x2xf32>
    %510 = arith.mulf %508, %509 : vector<4x2xf32>
    %cst_192 = arith.constant 0.00999999977 : f32
    %511 = vector.broadcast %cst_192 : f32 to vector<4x2xf32>
    %512 = arith.subf %510, %511 : vector<4x2xf32>
    %513 = vector.extract_strided_slice %506 {offsets = [0, 2], sizes = [4, 8], strides = [1, 1]} : vector<4x10xf32> to vector<4x8xf32>
    %cst_193 = arith.constant dense<0xFF800000> : vector<4xf32>
    %514 = vector.multi_reduction <maximumf>, %513, %cst_193 [1] : vector<4x8xf32> to vector<4xf32>
    %515 = vector.shape_cast %514 : vector<4xf32> to vector<4x1xf32>
    %516 = vector.broadcast %515 : vector<4x1xf32> to vector<4x8xf32>
    %517 = arith.subf %513, %516 : vector<4x8xf32>
    %518 = math.exp %517 : vector<4x8xf32>
    %cst_194 = arith.constant dense<0.000000e+00> : vector<4xf32>
    %519 = vector.multi_reduction <add>, %518, %cst_194 [1] : vector<4x8xf32> to vector<4xf32>
    %520 = vector.shape_cast %519 : vector<4xf32> to vector<4x1xf32>
    %521 = tpu.reciprocal %520 {approx = true} : vector<4x1xf32> -> vector<4x1xf32>
    %522 = vector.broadcast %521 : vector<4x1xf32> to vector<4x8xf32>
    %523 = arith.mulf %518, %522 : vector<4x8xf32>
    %524 = arith.addf %270, %512 : vector<4x2xf32>
    %525 = arith.subf %524, %52 : vector<4x2xf32>
    %526 = arith.mulf %525, %525 : vector<4x2xf32>
    %527 = vector.shape_cast %436 : vector<8x32xf32> to vector<1x8x32xf32>
    %cst_195 = arith.constant dense<0.000000e+00> : vector<1xf32>
    %528 = vector.multi_reduction <add>, %527, %cst_195 [1, 2] : vector<1x8x32xf32> to vector<1xf32>
    %529 = vector.shape_cast %528 : vector<1xf32> to vector<1x1x1xf32>
    %530 = vector.extract %529[0, 0, 0] : f32 from vector<1x1x1xf32>
    %531 = vector.broadcast %530 : f32 to vector<1x1xf32>
    %532 = vector.shape_cast %526 : vector<4x2xf32> to vector<1x4x2xf32>
    %cst_196 = arith.constant dense<0.000000e+00> : vector<1xf32>
    %533 = vector.multi_reduction <add>, %532, %cst_196 [1, 2] : vector<1x4x2xf32> to vector<1xf32>
    %534 = vector.shape_cast %533 : vector<1xf32> to vector<1x1x1xf32>
    %535 = vector.extract %534[0, 0, 0] : f32 from vector<1x1x1xf32>
    %536 = vector.broadcast %535 : f32 to vector<1x1xf32>
    %537 = arith.addf %531, %536 : vector<1x1xf32>
    %538 = vector.shape_cast %523 : vector<4x8xf32> to vector<1x4x8xf32>
    %cst_197 = arith.constant dense<0.000000e+00> : vector<1xf32>
    %539 = vector.multi_reduction <add>, %538, %cst_197 [1, 2] : vector<1x4x8xf32> to vector<1xf32>
    %540 = vector.shape_cast %539 : vector<1xf32> to vector<1x1x1xf32>
    %541 = vector.extract %540[0, 0, 0] : f32 from vector<1x1x1xf32>
    %542 = vector.broadcast %541 : f32 to vector<1x1xf32>
    %543 = tpu.reciprocal %542 {approx = true} : vector<1x1xf32> -> vector<1x1xf32>
    %544 = vector.broadcast %543 : vector<1x1xf32> to vector<4x8xf32>
    %545 = arith.mulf %523, %544 : vector<4x8xf32>
    %cst_198 = arith.constant 9.99999968E-21 : f32
    %546 = vector.broadcast %cst_198 : f32 to vector<4x8xf32>
    %547 = arith.addf %545, %546 : vector<4x8xf32>
    %548 = math.log %547 : vector<4x8xf32>
    %549 = arith.mulf %545, %548 : vector<4x8xf32>
    %550 = vector.shape_cast %549 : vector<4x8xf32> to vector<1x4x8xf32>
    %cst_199 = arith.constant dense<0.000000e+00> : vector<1xf32>
    %551 = vector.multi_reduction <add>, %550, %cst_199 [1, 2] : vector<1x4x8xf32> to vector<1xf32>
    %552 = vector.shape_cast %551 : vector<1xf32> to vector<1x1x1xf32>
    %553 = vector.extract %552[0, 0, 0] : f32 from vector<1x1x1xf32>
    %554 = vector.broadcast %553 : f32 to vector<1x1xf32>
    %cst_200 = arith.constant 0.000000e+00 : f32
    %555 = vector.broadcast %cst_200 : f32 to vector<1x1xf32>
    %556 = arith.subf %555, %554 : vector<1x1xf32>
    %cst_201 = arith.constant 1.000000e-03 : f32
    %557 = vector.broadcast %cst_201 : f32 to vector<1x1xf32>
    %558 = arith.mulf %556, %557 : vector<1x1xf32>
    %c1_202 = arith.constant 1 : index
    %c0_203 = arith.constant 0 : index
    %c0_204 = arith.constant 0 : index
    %559 = vector.load %arg3[%c1_202, %c0_203, %c0_204] : memref<2x4x128xf32, #tpu.memory_space<vmem>>, vector<1x4x2xf32>
    %560 = vector.shape_cast %559 : vector<1x4x2xf32> to vector<4x2xf32>
    %561 = vector.shape_cast %524 : vector<4x2xf32> to vector<1x4x2xf32>
    tpu.vector_store %arg3[%c1_202, %c0_203, %c0_204], %561 {strides = array<i32>} : memref<2x4x128xf32, #tpu.memory_space<vmem>>, vector<1x4x2xf32>,
    %c1_205 = arith.constant 1 : index
    %c0_206 = arith.constant 0 : index
    %c2_207 = arith.constant 2 : index
    %562 = vector.load %arg3[%c1_205, %c0_206, %c2_207] : memref<2x4x128xf32, #tpu.memory_space<vmem>>, vector<1x4x8xf32>
    %563 = vector.shape_cast %562 : vector<1x4x8xf32> to vector<4x8xf32>
    %564 = vector.shape_cast %523 : vector<4x8xf32> to vector<1x4x8xf32>
    tpu.vector_store %arg3[%c1_205, %c0_206, %c2_207], %564 {strides = array<i32>} : memref<2x4x128xf32, #tpu.memory_space<vmem>>, vector<1x4x8xf32>,
    %565 = vector.shape_cast %537 : vector<1x1xf32> to vector<1x1xf32>
    %566 = vector.broadcast %565 : vector<1x1xf32> to vector<4x1xf32>
    %c1_208 = arith.constant 1 : index
    %c0_209 = arith.constant 0 : index
    %c10_210 = arith.constant 10 : index
    %567 = vector.load %arg3[%c1_208, %c0_209, %c10_210] : memref<2x4x128xf32, #tpu.memory_space<vmem>>, vector<1x4x1xf32>
    %568 = vector.shape_cast %567 : vector<1x4x1xf32> to vector<4x1xf32>
    %569 = vector.shape_cast %566 : vector<4x1xf32> to vector<1x4x1xf32>
    tpu.vector_store %arg3[%c1_208, %c0_209, %c10_210], %569 {strides = array<i32>} : memref<2x4x128xf32, #tpu.memory_space<vmem>>, vector<1x4x1xf32>,
    %570 = vector.shape_cast %558 : vector<1x1xf32> to vector<1x1xf32>
    %571 = vector.broadcast %570 : vector<1x1xf32> to vector<4x1xf32>
    %c1_211 = arith.constant 1 : index
    %c0_212 = arith.constant 0 : index
    %c11_213 = arith.constant 11 : index
    %572 = vector.load %arg3[%c1_211, %c0_212, %c11_213] : memref<2x4x128xf32, #tpu.memory_space<vmem>>, vector<1x4x1xf32>
    %573 = vector.shape_cast %572 : vector<1x4x1xf32> to vector<4x1xf32>
    %574 = vector.shape_cast %571 : vector<4x1xf32> to vector<1x4x1xf32>
    tpu.vector_store %arg3[%c1_211, %c0_212, %c11_213], %574 {strides = array<i32>} : memref<2x4x128xf32, #tpu.memory_space<vmem>>, vector<1x4x1xf32>,
    %c0_214 = arith.constant 0 : index
    %c0_215 = arith.constant 0 : index
    %575 = vector.load %arg5[%c0_214, %c0_215] : memref<8x8xf32, #tpu.memory_space<vmem>>, vector<4x8xf32>
    tpu.vector_store %arg5[%c0_214, %c0_215], %523 {strides = array<i32>} : memref<8x8xf32, #tpu.memory_space<vmem>>, vector<4x8xf32>,
    %c4_216 = arith.constant 4 : index
    %c0_217 = arith.constant 0 : index
    %576 = vector.load %arg5[%c4_216, %c0_217] : memref<8x8xf32, #tpu.memory_space<vmem>>, vector<4x8xf32>
    tpu.vector_store %arg5[%c4_216, %c0_217], %523 {strides = array<i32>} : memref<8x8xf32, #tpu.memory_space<vmem>>, vector<4x8xf32>,
    return
  }
}

</mosaic_0001>

<bundles_post_ra>
// kernel: agent_forward.1
= control target key start
LH: loop header
LB: loop body
LE: loop exit
PB: predicated region body
PF: predicated region fallthrough
CT: control target
= control target key end

     0   :  { %vm151_vm0 = vcmask 1041408   ;;  %vm147_vm1 = vcmask 31744   ;;  %v2473_v0 = vmov 0.0   ;;  %vm2474_vm2 = vmmov 0   ;;  %s2476_s26 = smov 64   ;;  %s2477_s6 = smov 96   ;;  %s3131_s1 = inlined_call_operand.vmem [shape: bf16[480,128], index: 1, kind: input, shape index: {}]   ;;  %s3132_s0 = inlined_call_operand.vmem [shape: f32[56,128], index: 0, kind: input, shape index: {}]   ;;  %s3133_s2 = inlined_call_operand.vmem [shape: f32[16,128], index: 2, kind: input, shape index: {}]   ;;  %s3134_s3 = inlined_call_operand.vmem [shape: f32[2,4,128], index: 3, kind: output, shape index: {}]  }
   0x1   :  { %2112 = vmatprep.subr.bf16.mxu0 %v2473_v0  ;;  %v140_v1 = vld [vmem:[%s3131_s1] sm:$0x3]  ;;  %2114 = vmatprep.mubr.msk.bf16.mxu0 %vm2474_vm2, %v2473_v0  ;;  %v139_v3 = vld [vmem:[%s3132_s0 + $0x8] sm:$0xf]  ;;  %vm203_vm3 = vcmask 60416   ;;  %v2518_v7 = vld [vmem:[%s3131_s1 + $0x10] sm:$0xff]  }
   0x2   :  { %v138_v2 = vld [vmem:[%s3132_s0] sm:$0xff]  ;;  %v153_v4 = vsel %vm151_vm0, %v140_v1, 0  ;;  %v202_v6 = vld [vmem:[%s3132_s0 + $0x10] sm:$0xf]  ;;  %2134 = vmatprep.subr.bf16.mxu1 %v2473_v0  ;;  %2136 = vmatprep.mubr.msk.bf16.mxu1 %vm2474_vm2, %v2473_v0  ;;  %v2529_v8 = vld [vmem:[%s3131_s1 + $0x8] sm:$0xff]   ;;  %v2475_v9 = vmov 0  }
   0x3   :  { %v141_v5 = vpack.c.bf16 %v139_v3, %v138_v2  ;;  %2113 = vmatpush3.bf16.msra.mxu0 %v153_v4  ;;  %204 = vst.msk [vmem:[#allocation3] sm:$0xf] %vm203_vm3, %v202_v6  ;;  %205 = vst.msk [vmem:[#allocation3 + $0x4] sm:$0xf] %vm203_vm3, %v202_v6  ;;  %v2544_v14 = vld [vmem:[%s3133_s2 + $0x1] ss:$0 sm:$0xff] }
   0x4   :  { %2118 = vmatprep.subr.bf16.mxu0 %v2473_v0  ;;  %v1959_v21 = vld [vmem:[%s3133_s2] ss:$0 sm:$0xff]  ;;  %v2572_v46 = vld [vmem:[%s3131_s1 + $0x18] sm:$0xff]   ;;  %v25_v50 = vld [vmem:[%s3131_s1 + $0x28] sm:$0xf]  ;;  %vm400_vm4 = vcmask 1043456  }
   0x5   :  { %v2566_v44 = vld [vmem:[%s3131_s1 + $0x20] sm:$0xff]   ;;  %v2582_v51 = vsel %vm400_vm4, %v25_v50, 0  ;;  %vm396_vm5 = vcmask 64512   ;;  %vm218_vm6 = vcmask 261120   ;;  %v2599_v63 = vld [vmem:[%s3131_s1 + $0x38] sm:$0xff]   ;;  %v2609_v2 = vld [vmem:[%s3131_s1 + $0x30] sm:$0xff]  }
   0x6   :  { %2115 = vmatmul.mubr.msk.bf16.vlgmr.msra.gmra.mxu0 %vm147_vm1, %v141_v5  ;;  %2135 = vmatpush3.bf16.msra.mxu1 %v2582_v51  ;;  %vm200_vm9 = vcmask 781824   ;;  %vm392_vm10 = vcmask 257024   ;;  %s2478_s10 = smov 32   ;;  %vm715_vm12 = vcmask 517376   ;;  %vm717_vm13 = vcmask 521476   ;;  %15 = vst [vmem:[%s3134_s3] sm:$0xf] %v2473_v0 }
   0x7   :  { %2119 = vmatpush3.bf16.msra.mxu0 %v2518_v7  ;;  %2122 = vmatprep.mubr.msk.bf16.mxu0 %vm2474_vm2, %v2473_v0  ;;  %vm757_vm14 = vcmask 785408   ;;  %vm1031_vm4 = vcmask 523264   ;;  %16 = vst [vmem:[%s3134_s3 + $0x4] sm:$0xf] %v2473_v0  ;;  %s2479_s14 = smov 126  }
   0x8   :  { %2120 = vmatprep.subr.bf16.mxu0 %v2473_v0  ;;  %2148 = vmatprep.subr.bf16.mxu1 %v2473_v0 }
   0xa   :  { %v394_v54 = vld [vmem:[#allocation3] sm:$0xff] }
   0xb   :  { %2121 = vmatpush3.bf16.msra.mxu0 %v2529_v8  ;;  %v395_v56 = vpack.c.bf16 %v394_v54, %v394_v54  ;;  %v2643_v54 = vld [vmem:[%s3131_s1 + $0x48] sm:$0xff]  }
   0xc   :  { %2126 = vmatprep.subr.bf16.mxu0 %v2473_v0 }
   0xd   :  { %2137 = vmatmul.mubr.msk.bf16.vlgmr.msra.gmra.mxu1 %vm396_vm5, %v395_v56 }
   0xe   :  { %2123 = vmatmul.mubr.bf16.vlgmr.msra.gmra.mxu0 %v2475_v9  ;;  %2152 = vmatprep.mubr.msk.bf16.mxu1 %vm2474_vm2, %v2473_v0 }
   0xf   :  { %2130 = vmatprep.mubr.msk.bf16.mxu0 %vm2474_vm2, %v2473_v0  ;;  %2127 = vmatpush3.bf16.msra.mxu0 %v2566_v44 }
  0x10   :  { %2128 = vmatprep.subr.bf16.mxu0 %v2473_v0  ;;  %2149 = vmatpush3.bf16.msra.mxu1 %v2643_v54 }
  0x11   :  { %2150 = vmatprep.subr.bf16.mxu1 %v2473_v0 }
  0x13   :  { %2129 = vmatpush3.bf16.msra.mxu0 %v2572_v46 }
  0x14   :  { %2140 = vmatprep.subr.bf16.mxu0 %v2473_v0 }
  0xc6   :  { %v189_v10 = vpop.f32.mrf.mxu0 }
  0xc7   :  { %v2553_v22 = vadd.f32 %v1959_v21, %v189_v10  ;;  %v2622_v10 = vld [vmem:[%s3133_s2 + $0x2] ss:$0 sm:$0xff] }
  0xc8   :  { %v2116_v11 = vpop.f32.mrf.mxu0 }
  0xca   :  { %v192_v12 = vpop.f32.mrf.mxu0 }
  0xcb   :  { %v2556_v24 = vadd.f32 %v1959_v21, %v192_v12 }
  0xcc   :  { %v2117_v13 = vpop.f32.mrf.mxu0 }
  0xcd   :  { %v438_v3 = vpop.f32.mrf.mxu1 }
  0xce   :  { %v256_v15 = vpop.f32.mrf.mxu0 }
  0xcf   :  { %v257_v16 = vadd.f32 %v2544_v14, %v256_v15  ;;  %v2138_v4 = vpop.f32.mrf.mxu1 }
  0xd0   :  { %v2124_v17 = vpop.f32.mrf.mxu0 }
  0xd1   :  { %279 = vrot.lane.b32.xlu0 %v257_v16, %s2476_s26  ;;  %v263_v23 = vadd.f32 %v257_v16, %v2553_v22  ;;  %v441_v5 = vpop.f32.mrf.mxu1 }
  0xd2   :  { %v259_v18 = vpop.f32.mrf.mxu0 }
  0xd3   :  { %v260_v19 = vadd.f32 %v2544_v14, %v259_v18  ;;  %v265_v25 = vsub.f32 0.0, %v263_v23  ;;  %v2139_v6 = vpop.f32.mrf.mxu1 }
  0xd4   :  { %v2125_v20 = vpop.f32.mrf.mxu0 }
  0xd5   :  { %281 = vrot.lane.b32.xlu0 %v260_v19, %s2476_s26  ;;  %v264_v26 = vadd.f32 %v260_v19, %v2556_v24  ;;  %v267_v27 = vmul.f32 1.442695, %v265_v25  ;;  %v2629_v20 = vld [vmem:[%s3133_s2 + $0x4] ss:$0 sm:$0xff] }
  0xd7   :  { %v266_v28 = vsub.f32 0.0, %v264_v26  ;;  %2381 = vpow2.f32 %v267_v27 }
  0xd9   :  { %v269_v29 = vmul.f32 1.442695, %v266_v28 }
  0xdb   :  { %2383 = vpow2.f32 %v269_v29 }
  0xe4   :  { %v2382_v30 = vpop.eup %2381 }
  0xe5   :  { %v271_v31 = vadd.f32 1.0, %v2382_v30 }
  0xe7   :  { %2385 = vrcp.f32 %v271_v31 }
  0xe8   :  { %v2384_v32 = vpop.eup %2383 }
  0xe9   :  { %v272_v33 = vadd.f32 1.0, %v2384_v32 }
  0xeb   :  { %2387 = vrcp.f32 %v272_v33 }
  0xf4   :  { %v2386_v34 = vpop.eup %2385 }
  0xf5   :  { %v299_v49 = vsub.f32 1.0, %v2386_v34  ;;  %v311_v57 = vmul.f32 0.0, %v2386_v34 }
  0xf8   :  { %v2388_v37 = vpop.eup %2387 }
  0xf9   :  { %v300_v53 = vsub.f32 1.0, %v2388_v37  ;;  %v312_v58 = vmul.f32 0.0, %v2388_v37 }
 0x143   :  { %v280_v35 = vpop.permute.xlu0 %279 }
 0x144   :  { %v285_v36 = vmul.f32 %v2386_v34, %v280_v35 }
 0x146   :  { %289 = vrot.lane.b32.xlu1 %v285_v36, %s2476_s26 }
 0x147   :  { %v282_v38 = vpop.permute.xlu0 %281 }
 0x148   :  { %v286_v39 = vmul.f32 %v2388_v37, %v282_v38 }
 0x14a   :  { %291 = vrot.lane.b32.xlu1 %v286_v39, %s2476_s26  ;;  %v2636_v39 = vld [vmem:[%s3133_s2 + $0x3] ss:$0 sm:$0xff] }
 0x1b8   :  { %v290_v40 = vpop.permute.xlu1 %289 }
 0x1b9   :  { %v295_v41 = vadd.f32 %v290_v40, %v2553_v22  ;;  %v439_v40 = vadd.f32 %v2636_v39, %v438_v3 }
 0x1bb   :  { %2389 = vtanh.f32 %v295_v41 }
 0x1bc   :  { %v292_v42 = vpop.permute.xlu1 %291 }
 0x1bd   :  { %v296_v43 = vadd.f32 %v292_v42, %v2556_v24 }
 0x1bf   :  { %2391 = vtanh.f32 %v296_v43 }
 0x1c8   :  { %v2390_v45 = vpop.eup %2389 }
 0x1c9   :  { %303 = vrot.lane.b32.xlu0 %v2390_v45, %s2477_s6 }
 0x1cc   :  { %v2392_v47 = vpop.eup %2391 }
 0x1cd   :  { %305 = vrot.lane.b32.xlu1 %v2392_v47, %s2477_s6 }
 0x23b   :  { %v304_v48 = vpop.permute.xlu0 %303 }
 0x23c   :  { %v309_v52 = vmul.f32 %v304_v48, %v299_v49 }
 0x23e   :  { %v2587_v60 = vadd.f32 %v311_v57, %v309_v52  ;;  %v134_v57 = vld [vmem:[%s3132_s0 + $0x18] sm:$0xf] }
 0x23f   :  { %v306_v55 = vpop.permute.xlu1 %305 }
 0x240   :  { %v310_v59 = vmul.f32 %v306_v55, %v300_v53  ;;  %v2649_v55 = vld [vmem:[%s3131_s1 + $0x40] sm:$0xff]  }
 0x241   :  { %2151 = vmatpush3.bf16.msra.mxu1 %v2649_v55 }
 0x242   :  { %v2589_v61 = vadd.f32 %v312_v58, %v310_v59  ;;  %2164 = vmatprep.subr.bf16.mxu1 %v2473_v0 }
 0x244   :  { %v315_v62 = vpack.c.bf16 %v2589_v61, %v2587_v60 }
 0x246   :  { %317 = vrot.lane.b32.xlu0 %v315_v62, %s2477_s6 }
 0x2b8   :  { %v2601_v1 = vpop.permute.xlu0 %317 }
 0x2b9   :  { %2131 = vmatmul.mubr.msk.bf16.vlgmr.msra.gmra.mxu0 %vm218_vm6, %v2601_v1 }
 0x2ba   :  { %2141 = vmatpush3.bf16.msra.mxu0 %v2599_v63  ;;  %2144 = vmatprep.mubr.msk.bf16.mxu0 %vm2474_vm2, %v2473_v0 }
 0x2bb   :  { %2142 = vmatprep.subr.bf16.mxu0 %v2473_v0 }
 0x2be   :  { %2143 = vmatpush3.bf16.msra.mxu0 %v2609_v2 }
 0x2bf   :  { %2156 = vmatprep.subr.bf16.mxu0 %v2473_v0 }
 0x2c1   :  { %2145 = vmatmul.mubr.bf16.vlgmr.msra.gmra.mxu0 %v2475_v9 }
 0x2c2   :  { %2160 = vmatprep.mubr.msk.bf16.mxu0 %vm2474_vm2, %v2473_v0 }
 0x379   :  { %v368_v11 = vpop.f32.mrf.mxu0 }
 0x37a   :  { %v369_v12 = vadd.f32 %v2622_v10, %v368_v11 }
 0x37b   :  { %v2132_v13 = vpop.f32.mrf.mxu0 }
 0x37c   :  { %v377_v15 = vmin.f32 %v369_v12, 0.0  ;;  %vm375_vm7 = vcmp.gt.f32.partialorder %v369_v12, 0.0  ;;  %v2681_v13 = vld [vmem:[%s3131_s1 + $0x50] sm:$0xff]  }
 0x37d   :  { %v371_v16 = vpop.f32.mrf.mxu0 }
 0x37e   :  { %v379_v17 = vmul.f32 1.442695, %v377_v15  ;;  %v372_v18 = vadd.f32 %v2622_v10, %v371_v16  ;;  %v2688_v15 = vld [vmem:[%s3133_s2 + $0x5] ss:$0 sm:$0xff] }
 0x37f   :  { %v2133_v19 = vpop.f32.mrf.mxu0 }
 0x380   :  { %2393 = vpow2.f32 %v379_v17  ;;  %v378_v21 = vmin.f32 %v372_v18, 0.0  ;;  %vm376_vm8 = vcmp.gt.f32.partialorder %v372_v18, 0.0 }
 0x381   :  { %v490_v23 = vpop.f32.mrf.mxu0 }
 0x382   :  { %v381_v25 = vmul.f32 1.442695, %v378_v21  ;;  %v491_v26 = vadd.f32 %v2629_v20, %v490_v23 }
 0x383   :  { %v2146_v27 = vpop.f32.mrf.mxu0 }
 0x384   :  { %2395 = vpow2.f32 %v381_v25  ;;  %504 = vrot.lane.b32.xlu1 %v491_v26, %s2476_s26  ;;  %v496_v41 = vadd.f32 %v491_v26, %v439_v40 }
 0x385   :  { %v493_v28 = vpop.f32.mrf.mxu0 }
 0x386   :  { %v497_v42 = vsub.f32 0.0, %v496_v41 }
 0x387   :  { %v2147_v29 = vpop.f32.mrf.mxu0 }
 0x388   :  { %v498_v43 = vmul.f32 1.442695, %v497_v42  ;;  %v2694_v29 = vld [vmem:[%s3131_s1 + $0x98] sm:$0xff]  }
 0x38a   :  { %2397 = vpow2.f32 %v498_v43 }
 0x38d   :  { %v2394_v30 = vpop.eup %2393 }
 0x38e   :  { %v1966_v31 = vadd.f32 -1.0, %v2394_v30 }
 0x390   :  { %v385_v32 = vsel %vm375_vm7, %v369_v12, %v1966_v31  ;;  %v2674_v12 = vld [vmem:[%s3131_s1 + $0x58] sm:$0xff]   ;;  %vm1078_vm7 = vcmask 76816  }
 0x391   :  { %v2396_v33 = vpop.eup %2395  ;;  %v388_v34 = vrot.slane %v385_v32, 4  ;;  %2157 = vmatpush3.bf16.msra.mxu0 %v2674_v12 }
 0x392   :  { %v1967_v35 = vadd.f32 -1.0, %v2396_v33  ;;  %2158 = vmatprep.subr.bf16.mxu0 %v2473_v0  ;;  %v2701_v33 = vld [vmem:[%s3131_s1 + $0x90] sm:$0xff]  }
 0x393   :  { %v390_v36 = vmax.f32 %v385_v32, %v388_v34  ;;  %v2711_v34 = vld [vmem:[%s3131_s1 + $0x88] sm:$0xff]  }
 0x394   :  { %v386_v37 = vsel %vm376_vm8, %v372_v18, %v1967_v35  ;;  %v2718_v35 = vld [vmem:[%s3131_s1 + $0x80] sm:$0xff]   ;;  %vm1108_vm8 = vcmask 11264  }
 0x395   :  { %v391_v38 = vmax.f32 %v390_v36, %v386_v37  ;;  %2159 = vmatpush3.bf16.msra.mxu0 %v2681_v13  ;;  %v2725_v36 = vld [vmem:[%s3131_s1 + $0x78] sm:$0xff]   ;;  %v2732_v37 = vld [vmem:[%s3131_s1 + $0x70] sm:$0xff]  }
 0x396   :  { %2172 = vmatprep.subr.bf16.mxu0 %v2473_v0 }
 0x397   :  { %v2398_v45 = vpop.eup %2397 }
 0x398   :  { %v500_v47 = vadd.f32 1.0, %v2398_v45  ;;  %v2759_v45 = vld [vmem:[%s3133_s2 + $0x6] ss:$0 sm:$0xff] }
 0x39a   :  { %2399 = vrcp.f32 %v500_v47 }
 0x3a7   :  { %v2400_v48 = vpop.eup %2399 }
 0x3a8   :  { %v514_v58 = vsub.f32 1.0, %v2400_v48  ;;  %v520_v62 = vmul.f32 0.0, %v2400_v48 }
 0x3f6   :  { %v505_v49 = vpop.permute.xlu1 %504 }
 0x3f7   :  { %v507_v50 = vmul.f32 %v2400_v48, %v505_v49 }
 0x3f9   :  { %509 = vrot.lane.b32.xlu0 %v507_v50, %s2476_s26 }
 0x46b   :  { %v510_v52 = vpop.permute.xlu0 %509 }
 0x46c   :  { %v512_v53 = vadd.f32 %v510_v52, %v439_v40  ;;  %v2747_v40 = vld [vmem:[%s3131_s1 + $0x60] sm:$0xff]  }
 0x46e   :  { %2401 = vtanh.f32 %v512_v53 }
 0x47b   :  { %v2402_v56 = vpop.eup %2401 }
 0x47c   :  { %516 = vrot.lane.b32.xlu1 %v2402_v56, %s2477_s6 }
 0x480   :  { %197 = vrot.lane.b32.xlu1 %v134_v57, %s2476_s26 }
 0x4ee   :  { %v517_v59 = vpop.permute.xlu1 %516 }
 0x4ef   :  { %v519_v3 = vmul.f32 %v517_v59, %v514_v58 }
 0x4f1   :  { %v2659_v4 = vadd.f32 %v520_v62, %v519_v3  ;;  %v2765_v62 = vld [vmem:[%s3131_s1 + $0xa8] sm:$0xff]  }
 0x4f2   :  { %v198_v5 = vpop.permute.xlu1 %197 }
 0x4f3   :  { %201 = vst.msk [vmem:[#allocation2] sm:$0xf] %vm200_vm9, %v198_v5  ;;  %v522_v6 = vpack.c.bf16 %v2659_v4, %v2659_v4  ;;  %v2772_v5 = vld [vmem:[%s3131_s1 + $0xa0] sm:$0xff]  }
 0x4f4   :  { %393 = vst.msk [vmem:[#allocation2] sm:$0xf] %vm392_vm10, %v391_v38  ;;  %v2740_v38 = vld [vmem:[%s3131_s1 + $0x68] sm:$0xff]  }
 0x4f5   :  { %524 = vrot.lane.b32.xlu0 %v522_v6, %s2477_s6 }
 0x567   :  { %v2665_v11 = vpop.permute.xlu0 %524 }
 0x568   :  { %2153 = vmatmul.mubr.msk.bf16.vlgmr.msra.gmra.mxu1 %vm218_vm6, %v2665_v11 }
 0x569   :  { %2168 = vmatprep.mubr.msk.bf16.mxu1 %vm2474_vm2, %v2473_v0  ;;  %2165 = vmatpush3.bf16.msra.mxu1 %v2740_v38 }
 0x56a   :  { %2166 = vmatprep.subr.bf16.mxu1 %v2473_v0 }
 0x56d   :  { %2167 = vmatpush3.bf16.msra.mxu1 %v2747_v40 }
 0x56e   :  { %2188 = vmatprep.subr.bf16.mxu1 %v2473_v0 }
 0x628   :  { %v575_v16 = vpop.f32.mrf.mxu1 }
 0x629   :  { %v576_v17 = vadd.f32 %v2688_v15, %v575_v16 }
 0x62a   :  { %v2154_v18 = vpop.f32.mrf.mxu1 }
 0x62b   :  { %v582_v19 = vmin.f32 %v576_v17, 0.0  ;;  %vm581_vm11 = vcmp.gt.f32.partialorder %v576_v17, 0.0 }
 0x62c   :  { %v578_v21 = vpop.f32.mrf.mxu1 }
 0x62d   :  { %v583_v23 = vmul.f32 1.442695, %v582_v19 }
 0x62e   :  { %v2155_v25 = vpop.f32.mrf.mxu1 }
 0x62f   :  { %2403 = vpow2.f32 %v583_v23 }
 0x63c   :  { %v2404_v26 = vpop.eup %2403 }
 0x63d   :  { %v1974_v27 = vadd.f32 -1.0, %v2404_v26  ;;  %v2787_v26 = vld [vmem:[%s3133_s2 + $0x9] ss:$0 sm:$0xff] }
 0x63f   :  { %v586_v28 = vsel %vm581_vm11, %v576_v17, %v1974_v27 }
 0x640   :  { %v587_v30 = vpack.c.bf16 %v586_v28, %v586_v28  ;;  %v708_v31 = vrot.slane %v586_v28, 2 }
 0x642   :  { %2161 = vmatmul.mubr.msk.bf16.vlgmr.msra.gmra.mxu0 %vm218_vm6, %v587_v30  ;;  %v710_v32 = vmax.f32 %v586_v28, %v708_v31 }
 0x643   :  { %2173 = vmatpush3.bf16.msra.mxu0 %v2694_v29  ;;  %2184 = vmatprep.mubr.msk.bf16.mxu0 %vm2474_vm2, %v2473_v0 }
 0x644   :  { %712 = vrot.lane.b32.xlu0 %v710_v32, %s2478_s10  ;;  %2174 = vmatprep.subr.bf16.mxu0 %v2473_v0  ;;  %v2794_v32 = vld [vmem:[%s3133_s2 + $0x8] ss:$0 sm:$0xff] }
 0x647   :  { %2175 = vmatpush3.bf16.msra.mxu0 %v2701_v33 }
 0x648   :  { %2176 = vmatprep.subr.bf16.mxu0 %v2473_v0 }
 0x64b   :  { %2177 = vmatpush3.bf16.msra.mxu0 %v2711_v34 }
 0x64c   :  { %2178 = vmatprep.subr.bf16.mxu0 %v2473_v0 }
 0x64f   :  { %2179 = vmatpush3.bf16.msra.mxu0 %v2718_v35 }
 0x650   :  { %2180 = vmatprep.subr.bf16.mxu0 %v2473_v0 }
 0x653   :  { %2181 = vmatpush3.bf16.msra.mxu0 %v2725_v36 }
 0x654   :  { %2182 = vmatprep.subr.bf16.mxu0 %v2473_v0 }
 0x657   :  { %2183 = vmatpush3.bf16.msra.mxu0 %v2732_v37 }
 0x658   :  { %2212 = vmatprep.subr.bf16.mxu0 %v2473_v0 }
 0x6b6   :  { %v713_v41 = vpop.permute.xlu0 %712 }
 0x6b7   :  { %716 = vst.msk [vmem:[#allocation2] sm:$0x3] %vm715_vm12, %v713_v41 }
 0x6b8   :  { %718 = vst.msk [vmem:[#allocation2 - $0x2] sm:$0x30] %vm717_vm13, %v713_v41 }
 0x6bf   :  { %v719_v42 = vld [vmem:[#allocation2] sm:$0xf] }
 0x6c0   :  { %v720_v43 = vpack.c.bf16 %v719_v42, %v719_v42 }
 0x6c2   :  { %2185 = vmatmul.mubr.msk.bf16.vlgmr.msra.gmra.mxu0 %vm757_vm14, %v720_v43 }
 0x6c3   :  { %2220 = vmatprep.mubr.msk.bf16.mxu0 %vm2474_vm2, %v2473_v0 }
 0x702   :  { %v637_v47 = vpop.f32.mrf.mxu0 }
 0x703   :  { %v638_v48 = vadd.f32 %v2759_v45, %v637_v47 }
 0x704   :  { %v2162_v49 = vpop.f32.mrf.mxu0 }
 0x705   :  { %v644_v50 = vmin.f32 %v638_v48, 0.0  ;;  %vm643_vm15 = vcmp.gt.f32.partialorder %v638_v48, 0.0 }
 0x706   :  { %v640_v52 = vpop.f32.mrf.mxu0 }
 0x707   :  { %v645_v53 = vmul.f32 1.442695, %v644_v50 }
 0x708   :  { %v2163_v56 = vpop.f32.mrf.mxu0 }
 0x709   :  { %2405 = vpow2.f32 %v645_v53 }
 0x716   :  { %v2406_v57 = vpop.eup %2405 }
 0x717   :  { %v1978_v58 = vadd.f32 -1.0, %v2406_v57 }
 0x719   :  { %v648_v59 = vsel %vm643_vm15, %v638_v48, %v1978_v58  ;;  %v2801_v58 = vld [vmem:[%s3131_s1 + $0xb8] sm:$0xff]  }
 0x71a   :  { %v649_v3 = vpack.c.bf16 %v648_v59, %v648_v59  ;;  %v2807_v59 = vld [vmem:[%s3131_s1 + $0xb0] sm:$0xff]  }
 0x71c   :  { %2169 = vmatmul.mubr.msk.bf16.vlgmr.msra.gmra.mxu1 %vm218_vm6, %v649_v3 }
 0x71d   :  { %2189 = vmatpush3.bf16.msra.mxu1 %v2765_v62  ;;  %2192 = vmatprep.mubr.msk.bf16.mxu1 %vm2474_vm2, %v2473_v0 }
 0x71e   :  { %2190 = vmatprep.subr.bf16.mxu1 %v2473_v0 }
 0x721   :  { %2191 = vmatpush3.bf16.msra.mxu1 %v2772_v5 }
 0x722   :  { %2196 = vmatprep.subr.bf16.mxu1 %v2473_v0 }
 0x724   :  { %2193 = vmatmul.mubr.bf16.vlgmr.msra.gmra.mxu1 %v2475_v9 }
 0x725   :  { %2200 = vmatprep.mubr.msk.bf16.mxu1 %vm2474_vm2, %v2473_v0  ;;  %2197 = vmatpush3.bf16.msra.mxu1 %v2801_v58 }
 0x726   :  { %2198 = vmatprep.subr.bf16.mxu1 %v2473_v0 }
 0x729   :  { %2199 = vmatpush3.bf16.msra.mxu1 %v2807_v59 }
 0x72a   :  { %2204 = vmatprep.subr.bf16.mxu1 %v2473_v0 }
 0x782   :  { %v795_v6 = vpop.f32.mrf.mxu0 }
 0x783   :  { %v796_v41 = vadd.f32 %v2794_v32, %v795_v6 }
 0x784   :  { %v2186_v16 = vpop.f32.mrf.mxu0 }
 0x786   :  { %v798_v17 = vpop.f32.mrf.mxu0 }
 0x788   :  { %v2187_v18 = vpop.f32.mrf.mxu0 }
 0x7dc   :  { %v2782_v19 = vpop.f32.mrf.mxu1 }
 0x7de   :  { %v2170_v21 = vpop.f32.mrf.mxu1 }
 0x7e0   :  { %v702_v23 = vpop.f32.mrf.mxu1 }
 0x7e2   :  { %v2171_v25 = vpop.f32.mrf.mxu1 }
 0x7e4   :  { %v847_v27 = vpop.f32.mrf.mxu1 }
 0x7e5   :  { %v848_v9 = vadd.f32 %v2787_v26, %v847_v27  ;;  %v2827_v27 = vld [vmem:[%s3131_s1 + $0xc8] sm:$0xff]  }
 0x7e6   :  { %v2194_v28 = vpop.f32.mrf.mxu1 }
 0x7e7   :  { %861 = vrot.lane.b32.xlu1 %v848_v9, %s2476_s26  ;;  %v853_v42 = vadd.f32 %v848_v9, %v796_v41  ;;  %v2834_v9 = vld [vmem:[%s3131_s1 + $0xc0] sm:$0xff]   ;;  %v2841_v28 = vld [vmem:[%s3133_s2 + $0xa] ss:$0 sm:$0xff] }
 0x7e8   :  { %v850_v30 = vpop.f32.mrf.mxu1 }
 0x7e9   :  { %v854_v43 = vsub.f32 0.0, %v853_v42 }
 0x7ea   :  { %v2195_v31 = vpop.f32.mrf.mxu1 }
 0x7eb   :  { %v855_v47 = vmul.f32 1.442695, %v854_v43 }
 0x7ed   :  { %2407 = vpow2.f32 %v855_v47 }
 0x7fa   :  { %v2408_v48 = vpop.eup %2407 }
 0x7fb   :  { %v857_v49 = vadd.f32 1.0, %v2408_v48 }
 0x7fd   :  { %2409 = vrcp.f32 %v857_v49 }
 0x80a   :  { %v2410_v50 = vpop.eup %2409 }
 0x80b   :  { %v871_v6 = vsub.f32 1.0, %v2410_v50  ;;  %v877_v17 = vmul.f32 0.0, %v2410_v50 }
 0x859   :  { %v862_v52 = vpop.permute.xlu1 %861 }
 0x85a   :  { %v864_v53 = vmul.f32 %v2410_v50, %v862_v52 }
 0x85c   :  { %866 = vrot.lane.b32.xlu0 %v864_v53, %s2476_s26 }
 0x8ce   :  { %v867_v56 = vpop.permute.xlu0 %866 }
 0x8cf   :  { %v869_v57 = vadd.f32 %v867_v56, %v796_v41 }
 0x8d1   :  { %2411 = vtanh.f32 %v869_v57 }
 0x8de   :  { %v2412_v3 = vpop.eup %2411 }
 0x8df   :  { %873 = vrot.lane.b32.xlu1 %v2412_v3, %s2477_s6 }
 0x951   :  { %v874_v16 = vpop.permute.xlu1 %873 }
 0x952   :  { %v876_v18 = vmul.f32 %v874_v16, %v871_v6 }
 0x954   :  { %v2813_v21 = vadd.f32 %v877_v17, %v876_v18 }
 0x956   :  { %v879_v23 = vpack.c.bf16 %v2813_v21, %v2813_v21 }
 0x958   :  { %881 = vrot.lane.b32.xlu0 %v879_v23, %s2477_s6 }
 0x9ca   :  { %v2818_v25 = vpop.permute.xlu0 %881 }
 0x9cb   :  { %2201 = vmatmul.mubr.msk.bf16.vlgmr.msra.gmra.mxu1 %vm218_vm6, %v2818_v25 }
 0x9cc   :  { %2208 = vmatprep.mubr.msk.bf16.mxu1 %vm2474_vm2, %v2473_v0  ;;  %2205 = vmatpush3.bf16.msra.mxu1 %v2827_v27 }
 0x9cd   :  { %2206 = vmatprep.subr.bf16.mxu1 %v2473_v0 }
 0x9d0   :  { %2207 = vmatpush3.bf16.msra.mxu1 %v2834_v9 }
 0x9d1   :  { %2224 = vmatprep.subr.bf16.mxu1 %v2473_v0 }
 0xa8b   :  { %v932_v30 = vpop.f32.mrf.mxu1 }
 0xa8c   :  { %v933_v31 = vadd.f32 %v2841_v28, %v932_v30 }
 0xa8d   :  { %v2202_v41 = vpop.f32.mrf.mxu1 }
 0xa8e   :  { %v939_v42 = vmin.f32 %v933_v31, 0.0  ;;  %vm938_vm0 = vcmp.gt.f32.partialorder %v933_v31, 0.0 }
 0xa8f   :  { %v935_v43 = vpop.f32.mrf.mxu1 }
 0xa90   :  { %v940_v47 = vmul.f32 1.442695, %v939_v42 }
 0xa91   :  { %v2203_v48 = vpop.f32.mrf.mxu1 }
 0xa92   :  { %2413 = vpow2.f32 %v940_v47 }
 0xa9f   :  { %v2414_v49 = vpop.eup %2413 }
 0xaa0   :  { %v1994_v50 = vadd.f32 -1.0, %v2414_v49 }
 0xaa2   :  { %v943_v52 = vsel %vm938_vm0, %v933_v31, %v1994_v50 }
 0xaa3   :  { %v944_v53 = vpack.c.bf16 %v943_v52, %v943_v52 }
 0xaa5   :  { %2209 = vmatmul.mubr.msk.bf16.vlgmr.msra.gmra.mxu1 %vm218_vm6, %v944_v53 }
 0xaa6   :  { %2225 = vmatpush3.bf16.msra.mxu1 %v2518_v7  ;;  %2228 = vmatprep.mubr.msk.bf16.mxu1 %vm2474_vm2, %v2473_v0  ;;  %v2862_v7 = vld [vmem:[%s3131_s1 + $0xe8] sm:$0xff]  }
 0xaa7   :  { %2226 = vmatprep.subr.bf16.mxu1 %v2473_v0  ;;  %2213 = vmatpush3.bf16.msra.mxu0 %v2862_v7 }
 0xaa8   :  { %2214 = vmatprep.subr.bf16.mxu0 %v2473_v0 }
 0xaaa   :  { %2227 = vmatpush3.bf16.msra.mxu1 %v2529_v8  ;;  %v2869_v8 = vld [vmem:[%s3131_s1 + $0xe0] sm:$0xff]  }
 0xaab   :  { %2232 = vmatprep.subr.bf16.mxu1 %v2473_v0  ;;  %2215 = vmatpush3.bf16.msra.mxu0 %v2869_v8 }
 0xaac   :  { %2216 = vmatprep.subr.bf16.mxu0 %v2473_v0 }
 0xaad   :  { %2229 = vmatmul.mubr.msk.bf16.vlgmr.msra.gmra.mxu1 %vm218_vm6, %v2601_v1  ;;  %v2890_v1 = vld [vmem:[%s3133_s2 + $0xb] ss:$0 sm:$0xff] }
 0xaae   :  { %2233 = vmatpush3.bf16.msra.mxu1 %v2566_v44  ;;  %2236 = vmatprep.mubr.msk.bf16.mxu1 %vm2474_vm2, %v2473_v0  ;;  %v2876_v44 = vld [vmem:[%s3131_s1 + $0xd8] sm:$0xff]  }
 0xaaf   :  { %2234 = vmatprep.subr.bf16.mxu1 %v2473_v0  ;;  %2217 = vmatpush3.bf16.msra.mxu0 %v2876_v44 }
 0xab0   :  { %2218 = vmatprep.subr.bf16.mxu0 %v2473_v0 }
 0xab2   :  { %2235 = vmatpush3.bf16.msra.mxu1 %v2572_v46  ;;  %v2883_v46 = vld [vmem:[%s3131_s1 + $0xd0] sm:$0xff]  }
 0xab3   :  { %2246 = vmatprep.subr.bf16.mxu1 %v2473_v0  ;;  %2219 = vmatpush3.bf16.msra.mxu0 %v2883_v46 }
 0xab4   :  { %2240 = vmatprep.subr.bf16.mxu0 %v2473_v0 }
 0xb65   :  { %v994_v56 = vpop.f32.mrf.mxu1 }
 0xb66   :  { %v995_v57 = vadd.f32 %v2890_v1, %v994_v56 }
 0xb67   :  { %v2210_v3 = vpop.f32.mrf.mxu1 }
 0xb68   :  { %v1001_v6 = vmin.f32 %v995_v57, 0.0  ;;  %vm1000_vm1 = vcmp.gt.f32.partialorder %v995_v57, 0.0 }
 0xb69   :  { %v997_v16 = vpop.f32.mrf.mxu1 }
 0xb6a   :  { %v1002_v17 = vmul.f32 1.442695, %v1001_v6 }
 0xb6b   :  { %v2211_v18 = vpop.f32.mrf.mxu1 }
 0xb6c   :  { %2415 = vpow2.f32 %v1002_v17 }
 0xb6d   :  { %v1201_v23 = vpop.f32.mrf.mxu1 }
 0xb6e   :  { %v1202_v30 = vadd.f32 %v2544_v14, %v1201_v23 }
 0xb6f   :  { %v2230_v31 = vpop.f32.mrf.mxu1 }
 0xb70   :  { %1224 = vrot.lane.b32.xlu0 %v1202_v30, %s2476_s26 }
 0xb71   :  { %v1204_v41 = vpop.f32.mrf.mxu1 }
 0xb72   :  { %v1205_v42 = vadd.f32 %v2544_v14, %v1204_v41  ;;  %v1208_v14 = vadd.f32 %v1202_v30, %v2553_v22 }
 0xb73   :  { %v2231_v43 = vpop.f32.mrf.mxu1 }
 0xb74   :  { %1226 = vrot.lane.b32.xlu0 %v1205_v42, %s2476_s26  ;;  %v1210_v52 = vsub.f32 0.0, %v1208_v14  ;;  %v1209_v53 = vadd.f32 %v1205_v42, %v2556_v24  ;;  %v2917_v43 = vld [vmem:[%s3133_s2 + $0xc] ss:$0 sm:$0xff] }
 0xb76   :  { %v1212_v56 = vmul.f32 1.442695, %v1210_v52  ;;  %v1211_v3 = vsub.f32 0.0, %v1209_v53 }
 0xb78   :  { %2417 = vpow2.f32 %v1212_v56 }
 0xb79   :  { %v2416_v47 = vpop.eup %2415 }
 0xb7a   :  { %v1998_v48 = vadd.f32 -1.0, %v2416_v47 }
 0xb7c   :  { %v1005_v49 = vsel %vm1000_vm1, %v995_v57, %v1998_v48  ;;  %v1214_v57 = vmul.f32 1.442695, %v1211_v3  ;;  %v137_v3 = vld [vmem:[%s3132_s0 + $0x30] sm:$0xf] }
 0xb7d   :  { %v1006_v50 = vpack.c.bf16 %v1005_v49, %v1005_v49 }
 0xb7e   :  { %2419 = vpow2.f32 %v1214_v57 }
 0xb7f   :  { %2221 = vmatmul.mubr.msk.bf16.vlgmr.msra.gmra.mxu0 %vm1031_vm4, %v1006_v50 }
 0xb80   :  { %2241 = vmatpush3.bf16.msra.mxu0 %v2582_v51  ;;  %2242 = vmatprep.mubr.msk.bf16.mxu0 %vm2474_vm2, %v2473_v0 }
 0xb81   :  { %2254 = vmatprep.subr.bf16.mxu0 %v2473_v0 }
 0xb85   :  { %v2418_v6 = vpop.eup %2417 }
 0xb86   :  { %v1216_v16 = vadd.f32 1.0, %v2418_v6 }
 0xb88   :  { %2421 = vrcp.f32 %v1216_v16 }
 0xb8b   :  { %v2420_v17 = vpop.eup %2419 }
 0xb8c   :  { %v1217_v51 = vadd.f32 1.0, %v2420_v17 }
 0xb8e   :  { %2423 = vrcp.f32 %v1217_v51 }
 0xb95   :  { %v2422_v18 = vpop.eup %2421 }
 0xb9b   :  { %v2424_v31 = vpop.eup %2423 }
 0xbe2   :  { %v1225_v23 = vpop.permute.xlu0 %1224 }
 0xbe3   :  { %v1230_v30 = vmul.f32 %v2422_v18, %v1225_v23 }
 0xbe5   :  { %1234 = vrot.lane.b32.xlu0 %v1230_v30, %s2476_s26 }
 0xbe6   :  { %v1227_v41 = vpop.permute.xlu0 %1226 }
 0xbe7   :  { %v1231_v42 = vmul.f32 %v2424_v31, %v1227_v41 }
 0xbe9   :  { %1236 = vrot.lane.b32.xlu0 %v1231_v42, %s2476_s26 }
 0xc3f   :  { %v1069_v47 = vpop.f32.mrf.mxu0 }
 0xc40   :  { %v1070_v48 = vadd.f32 %v2917_v43, %v1069_v47 }
 0xc41   :  { %v2222_v49 = vpop.f32.mrf.mxu0 }
 0xc42   :  { %2425 = vtanh.f32 %v1070_v48  ;;  %v1079_v50 = vsel %vm1078_vm7, %v1070_v48, -inf }
 0xc43   :  { %1080 = vmax.xlane.f32.xlu1 %v1079_v50  ;;  %v1072_v14 = vpop.f32.mrf.mxu0 }
 0xc45   :  { %v2223_v52 = vpop.f32.mrf.mxu0 }
 0xc4f   :  { %v2426_v53 = vpop.eup %2425 }
 0xc50   :  { %v1076_v56 = vmul.f32 0.02, %v2426_v53  ;;  %v1245_v53 = vsub.f32 1.0, %v2424_v31 }
 0xc52   :  { %v2004_v57 = vadd.f32 -0.01, %v1076_v56  ;;  %v1244_v56 = vsub.f32 1.0, %v2422_v18 }
 0xc54   :  { %v2924_v6 = vadd.f32 %v2004_v57, %v137_v3 }
 0xc56   :  { %1159 = vst.msk [vmem:[%s3134_s3] sm:$0xf] %vm1108_vm8, %v2924_v6 }
 0xc57   :  { %v1235_v16 = vpop.permute.xlu0 %1234 }
 0xc58   :  { %v1240_v17 = vadd.f32 %v1235_v16, %v2553_v22  ;;  %v1257_v16 = vmul.f32 %v2424_v31, %v2589_v61 }
 0xc5a   :  { %2427 = vtanh.f32 %v1240_v17 }
 0xc5b   :  { %v1237_v51 = vpop.permute.xlu0 %1236 }
 0xc5c   :  { %v1241_v23 = vadd.f32 %v1237_v51, %v2556_v24 }
 0xc5e   :  { %2429 = vtanh.f32 %v1241_v23 }
 0xc67   :  { %v2428_v30 = vpop.eup %2427 }
 0xc68   :  { %1248 = vrot.lane.b32.xlu1 %v2428_v30, %s2477_s6 }
 0xc6b   :  { %v2430_v41 = vpop.eup %2429 }
 0xc6c   :  { %1250 = vrot.lane.b32.xlu1 %v2430_v41, %s2477_s6 }
 0xccc   :  { %v1081_v42 = vpop.xlane.xlu1 %1080 }
 0xccd   :  { %v1082_v47 = vsub.f32 %v1070_v48, %v1081_v42  ;;  %v1256_v48 = vmul.f32 %v2422_v18, %v2587_v60 }
 0xccf   :  { %v1083_v49 = vmul.f32 1.442695, %v1082_v47 }
 0xcd1   :  { %2431 = vpow2.f32 %v1083_v49 }
 0xcda   :  { %v1249_v24 = vpop.permute.xlu1 %1248 }
 0xcdb   :  { %v1254_v57 = vmul.f32 %v1249_v24, %v1244_v56 }
 0xcdd   :  { %v1258_v51 = vadd.f32 %v1256_v48, %v1254_v57 }
 0xcde   :  { %v2432_v50 = vpop.eup %2431  ;;  %v1251_v52 = vpop.permute.xlu1 %1250 }
 0xcdf   :  { %1086 = vrot.lane.b32.xlu0 %v2432_v50, %s2479_s14  ;;  %v1255_v3 = vmul.f32 %v1251_v52, %v1245_v53 }
 0xce1   :  { %v1259_v17 = vadd.f32 %v1257_v16, %v1255_v3 }
 0xce3   :  { %v1260_v23 = vpack.c.bf16 %v1259_v17, %v1258_v51 }
 0xd51   :  { %v1087_v22 = vpop.permute.xlu0 %1086 }
 0xd52   :  { %v1089_v14 = vsel %vm203_vm3, %v1087_v22, 0.0 }
 0xd53   :  { %1090 = vadd.xlane.f32.xlu0 %v1089_v14 }
 0xd69   :  { %1262 = vrot.lane.b32.xlu0 %v1260_v23, %s2477_s6 }
 0xddc   :  { %v1091_v30 = vpop.xlane.xlu0 %1090 }
 0xddd   :  { %2433 = vrcp.f32 %v1091_v30 }
 0xde0   :  { %v1263_v41 = vpop.permute.xlu0 %1262 }
 0xde1   :  { %2237 = vmatmul.mubr.msk.bf16.vlgmr.msra.gmra.mxu1 %vm218_vm6, %v1263_v41 }
 0xde2   :  { %2247 = vmatpush3.bf16.msra.mxu1 %v2599_v63  ;;  %2250 = vmatprep.mubr.msk.bf16.mxu1 %vm2474_vm2, %v2473_v0 }
 0xde3   :  { %2248 = vmatprep.subr.bf16.mxu1 %v2473_v0 }
 0xde6   :  { %2249 = vmatpush3.bf16.msra.mxu1 %v2609_v2 }
 0xde7   :  { %2262 = vmatprep.subr.bf16.mxu1 %v2473_v0 }
 0xde9   :  { %2251 = vmatmul.mubr.msk.bf16.vlgmr.msra.gmra.mxu1 %vm218_vm6, %v2665_v11 }
 0xdea   :  { %v2434_v60 = vpop.eup %2433  ;;  %2263 = vmatpush3.bf16.msra.mxu1 %v2674_v12  ;;  %2266 = vmatprep.mubr.msk.bf16.mxu1 %vm2474_vm2, %v2473_v0 }
 0xdeb   :  { %v2952_v61 = vmul.f32 %v2434_v60, %v2432_v50  ;;  %2264 = vmatprep.subr.bf16.mxu1 %v2473_v0 }
 0xded   :  { %1122 = vrot.lane.b32.xlu1 %v2952_v61, %s2479_s14  ;;  %1160 = vst.msk [vmem:[%s3134_s3] sm:$0xf] %vm1078_vm7, %v2952_v61 }
 0xdee   :  { %2265 = vmatpush3.bf16.msra.mxu1 %v2681_v13 }
 0xdef   :  { %2278 = vmatprep.subr.bf16.mxu1 %v2473_v0 }
 0xe5f   :  { %v2964_v63 = vpop.permute.xlu1 %1122 }
 0xe60   :  { %1165 = vst.msk [vmem:[#allocation3] sm:$0xf] %vm203_vm3, %v2964_v63  ;;  %1166 = vst.msk [vmem:[#allocation3 + $0x4] sm:$0xf] %vm203_vm3, %v2964_v63 }
 0xe67   :  { %v1326_v2 = vld [vmem:[#allocation3] sm:$0xff] }
 0xe68   :  { %v1327_v11 = vpack.c.bf16 %v1326_v2, %v1326_v2 }
 0xe6a   :  { %2243 = vmatmul.mubr.msk.bf16.vlgmr.msra.gmra.mxu0 %vm396_vm5, %v1327_v11 }
 0xe6b   :  { %2255 = vmatpush3.bf16.msra.mxu0 %v2643_v54  ;;  %2258 = vmatprep.mubr.msk.bf16.mxu0 %vm2474_vm2, %v2473_v0 }
 0xe6c   :  { %2256 = vmatprep.subr.bf16.mxu0 %v2473_v0 }
 0xe6f   :  { %2257 = vmatpush3.bf16.msra.mxu0 %v2649_v55 }
 0xe70   :  { %2270 = vmatprep.subr.bf16.mxu0 %v2473_v0 }
 0xea1   :  { %v1301_v12 = vpop.f32.mrf.mxu1 }
 0xea2   :  { %v1302_v13 = vadd.f32 %v2622_v10, %v1301_v12 }
 0xea3   :  { %v2238_v18 = vpop.f32.mrf.mxu1 }
 0xea4   :  { %v1310_v31 = vmin.f32 %v1302_v13, 0.0  ;;  %vm1308_vm5 = vcmp.gt.f32.partialorder %v1302_v13, 0.0 }
 0xea5   :  { %v1304_v42 = vpop.f32.mrf.mxu1 }
 0xea6   :  { %v1312_v47 = vmul.f32 1.442695, %v1310_v31  ;;  %v1305_v49 = vadd.f32 %v2622_v10, %v1304_v42 }
 0xea7   :  { %v2239_v50 = vpop.f32.mrf.mxu1 }
 0xea8   :  { %2435 = vpow2.f32 %v1312_v47  ;;  %v1311_v54 = vmin.f32 %v1305_v49, 0.0  ;;  %vm1309_vm9 = vcmp.gt.f32.partialorder %v1305_v49, 0.0 }
 0xea9   :  { %v1405_v22 = vpop.f32.mrf.mxu1 }
 0xeaa   :  { %v1314_v14 = vmul.f32 1.442695, %v1311_v54  ;;  %v1406_v24 = vadd.f32 %v2629_v20, %v1405_v22 }
 0xeab   :  { %v2252_v52 = vpop.f32.mrf.mxu1 }
 0xeac   :  { %2437 = vpow2.f32 %v1314_v14  ;;  %1419 = vrot.lane.b32.xlu1 %v1406_v24, %s2476_s26 }
 0xead   :  { %v1408_v55 = vpop.f32.mrf.mxu1 }
 0xeaf   :  { %v2253_v53 = vpop.f32.mrf.mxu1 }
 0xeb5   :  { %v2436_v56 = vpop.eup %2435 }
 0xeb6   :  { %v2007_v3 = vadd.f32 -1.0, %v2436_v56 }
 0xeb8   :  { %v1318_v57 = vsel %vm1308_vm5, %v1302_v13, %v2007_v3 }
 0xeb9   :  { %v2438_v16 = vpop.eup %2437  ;;  %v1321_v48 = vrot.slane %v1318_v57, 4 }
 0xeba   :  { %v2008_v10 = vadd.f32 -1.0, %v2438_v16 }
 0xebb   :  { %v1323_v17 = vmax.f32 %v1318_v57, %v1321_v48 }
 0xebc   :  { %v1319_v51 = vsel %vm1309_vm9, %v1305_v49, %v2008_v10 }
 0xebd   :  { %v1324_v23 = vmax.f32 %v1323_v17, %v1319_v51 }
 0xebf   :  { %1325 = vst.msk [vmem:[#allocation2] sm:$0xf] %vm392_vm10, %v1324_v23 }
 0xf1e   :  { %v1420_v47 = vpop.permute.xlu1 %1419 }
 0xf2a   :  { %v1365_v20 = vpop.f32.mrf.mxu0 }
 0xf2b   :  { %v1366_v30 = vadd.f32 %v2636_v39, %v1365_v20 }
 0xf2c   :  { %v2244_v41 = vpop.f32.mrf.mxu0 }
 0xf2d   :  { %v1411_v60 = vadd.f32 %v1406_v24, %v1366_v30 }
 0xf2e   :  { %v1368_v2 = vpop.f32.mrf.mxu0 }
 0xf2f   :  { %v1412_v11 = vsub.f32 0.0, %v1411_v60 }
 0xf30   :  { %v2245_v12 = vpop.f32.mrf.mxu0 }
 0xf31   :  { %v1413_v18 = vmul.f32 1.442695, %v1412_v11 }
 0xf33   :  { %2439 = vpow2.f32 %v1413_v18 }
 0xf40   :  { %v2440_v13 = vpop.eup %2439 }
 0xf41   :  { %v1415_v31 = vadd.f32 1.0, %v2440_v13 }
 0xf43   :  { %2441 = vrcp.f32 %v1415_v31 }
 0xf50   :  { %v2442_v42 = vpop.eup %2441 }
 0xf51   :  { %v1422_v50 = vmul.f32 %v2442_v42, %v1420_v47  ;;  %v1429_v39 = vsub.f32 1.0, %v2442_v42  ;;  %v1435_v24 = vmul.f32 %v2442_v42, %v2659_v4 }
 0xf53   :  { %1424 = vrot.lane.b32.xlu1 %v1422_v50, %s2476_s26 }
 0xfc5   :  { %v1425_v49 = vpop.permute.xlu1 %1424 }
 0xfc6   :  { %v1427_v54 = vadd.f32 %v1425_v49, %v1366_v30 }
 0xfc8   :  { %2443 = vtanh.f32 %v1427_v54 }
 0xfd5   :  { %v2444_v22 = vpop.eup %2443 }
 0xfd6   :  { %1431 = vrot.lane.b32.xlu1 %v2444_v22, %s2477_s6 }
0x1048   :  { %v1432_v14 = vpop.permute.xlu1 %1431 }
0x1049   :  { %v1434_v52 = vmul.f32 %v1432_v14, %v1429_v39 }
0x104b   :  { %v1436_v55 = vadd.f32 %v1435_v24, %v1434_v52 }
0x104d   :  { %v1437_v53 = vpack.c.bf16 %v1436_v55, %v1436_v55 }
0x104f   :  { %1439 = vrot.lane.b32.xlu1 %v1437_v53, %s2477_s6 }
0x10c1   :  { %v1440_v56 = vpop.permute.xlu1 %1439 }
0x10c2   :  { %2259 = vmatmul.mubr.msk.bf16.vlgmr.msra.gmra.mxu0 %vm218_vm6, %v1440_v56 }
0x10c3   :  { %2271 = vmatpush3.bf16.msra.mxu0 %v2740_v38  ;;  %2274 = vmatprep.mubr.msk.bf16.mxu0 %vm2474_vm2, %v2473_v0 }
0x10c4   :  { %2272 = vmatprep.subr.bf16.mxu0 %v2473_v0 }
0x10c7   :  { %2273 = vmatpush3.bf16.msra.mxu0 %v2747_v40 }
0x10c8   :  { %2294 = vmatprep.subr.bf16.mxu0 %v2473_v0 }
0x1182   :  { %v1478_v4 = vpop.f32.mrf.mxu0 }
0x1183   :  { %v1479_v3 = vadd.f32 %v2688_v15, %v1478_v4 }
0x1184   :  { %v2260_v57 = vpop.f32.mrf.mxu0 }
0x1185   :  { %v1485_v16 = vmin.f32 %v1479_v3, 0.0  ;;  %vm1484_vm10 = vcmp.gt.f32.partialorder %v1479_v3, 0.0 }
0x1186   :  { %v1481_v48 = vpop.f32.mrf.mxu0 }
0x1187   :  { %v1486_v10 = vmul.f32 1.442695, %v1485_v16 }
0x1188   :  { %v2261_v17 = vpop.f32.mrf.mxu0 }
0x1189   :  { %2445 = vpow2.f32 %v1486_v10  ;;  %v3051_v10 = vld [vmem:[%s3133_s2 + $0x7] ss:$0 sm:$0xff] }
0x118a   :  { %v700_v17 = vadd.f32 %v3051_v10, %v2782_v19 }
0x1196   :  { %v2446_v51 = vpop.eup %2445 }
0x1197   :  { %v2012_v38 = vadd.f32 -1.0, %v2446_v51  ;;  %v3058_v51 = vld [vmem:[%s3132_s0 + $0x20] sm:$0xff] }
0x1199   :  { %v1489_v23 = vsel %vm1484_vm10, %v1479_v3, %v2012_v38  ;;  %v3064_v38 = vld [vmem:[%s3132_s0 + $0x28] sm:$0xf] }
0x119a   :  { %v1490_v20 = vpack.c.bf16 %v1489_v23, %v1489_v23  ;;  %v1587_v30 = vrot.slane %v1489_v23, 2 }
0x119c   :  { %2267 = vmatmul.mubr.msk.bf16.vlgmr.msra.gmra.mxu1 %vm218_vm6, %v1490_v20  ;;  %v1589_v40 = vmax.f32 %v1489_v23, %v1587_v30  ;;  %v1095_v20 = vsub.f32 %v2924_v6, %v3064_v38 }
0x119d   :  { %2279 = vmatpush3.bf16.msra.mxu1 %v2694_v29  ;;  %2290 = vmatprep.mubr.msk.bf16.mxu1 %vm2474_vm2, %v2473_v0 }
0x119e   :  { %1591 = vrot.lane.b32.xlu0 %v1589_v40, %s2478_s10  ;;  %2280 = vmatprep.subr.bf16.mxu1 %v2473_v0  ;;  %v1096_v40 = vmul.f32 %v1095_v20, %v1095_v20 }
0x11a0   :  { %v1109_v19 = vsel %vm1108_vm8, %v1096_v40, 0.0 }
0x11a1   :  { %2281 = vmatpush3.bf16.msra.mxu1 %v2701_v33 }
0x11a2   :  { %2282 = vmatprep.subr.bf16.mxu1 %v2473_v0 }
0x11a5   :  { %2283 = vmatpush3.bf16.msra.mxu1 %v2711_v34 }
0x11a6   :  { %2284 = vmatprep.subr.bf16.mxu1 %v2473_v0 }
0x11a9   :  { %2285 = vmatpush3.bf16.msra.mxu1 %v2718_v35 }
0x11aa   :  { %2286 = vmatprep.subr.bf16.mxu1 %v2473_v0 }
0x11ad   :  { %2287 = vmatpush3.bf16.msra.mxu1 %v2725_v36 }
0x11ae   :  { %2288 = vmatprep.subr.bf16.mxu1 %v2473_v0 }
0x11b1   :  { %2289 = vmatpush3.bf16.msra.mxu1 %v2732_v37 }
0x11b2   :  { %2318 = vmatprep.subr.bf16.mxu1 %v2473_v0 }
0x1210   :  { %v1592_v15 = vpop.permute.xlu0 %1591 }
0x1211   :  { %1594 = vst.msk [vmem:[#allocation2] sm:$0x3] %vm715_vm12, %v1592_v15 }
0x1212   :  { %1595 = vst.msk [vmem:[#allocation2 - $0x2] sm:$0x30] %vm717_vm13, %v1592_v15 }
0x1219   :  { %v1596_v29 = vld [vmem:[#allocation2] sm:$0xf] }
0x121a   :  { %v1597_v33 = vpack.c.bf16 %v1596_v29, %v1596_v29 }
0x121c   :  { %2291 = vmatmul.mubr.msk.bf16.vlgmr.msra.gmra.mxu1 %vm757_vm14, %v1597_v33 }
0x121d   :  { %2319 = vmatpush3.bf16.msra.mxu1 %v2862_v7  ;;  %2326 = vmatprep.mubr.msk.bf16.mxu1 %vm2474_vm2, %v2473_v0 }
0x121e   :  { %2320 = vmatprep.subr.bf16.mxu1 %v2473_v0 }
0x1221   :  { %2321 = vmatpush3.bf16.msra.mxu1 %v2869_v8 }
0x1222   :  { %2322 = vmatprep.subr.bf16.mxu1 %v2473_v0 }
0x1225   :  { %2323 = vmatpush3.bf16.msra.mxu1 %v2876_v44 }
0x1226   :  { %2324 = vmatprep.subr.bf16.mxu1 %v2473_v0 }
0x1229   :  { %2325 = vmatpush3.bf16.msra.mxu1 %v2883_v46 }
0x125c   :  { %v1528_v34 = vpop.f32.mrf.mxu1 }
0x125d   :  { %v1529_v35 = vadd.f32 %v2759_v45, %v1528_v34 }
0x125e   :  { %v2268_v36 = vpop.f32.mrf.mxu1 }
0x125f   :  { %v1535_v37 = vmin.f32 %v1529_v35, 0.0  ;;  %vm1534_vm11 = vcmp.gt.f32.partialorder %v1529_v35, 0.0 }
0x1260   :  { %v1531_v7 = vpop.f32.mrf.mxu1 }
0x1261   :  { %v1536_v41 = vmul.f32 1.442695, %v1535_v37 }
0x1262   :  { %v2269_v60 = vpop.f32.mrf.mxu1 }
0x1263   :  { %2447 = vpow2.f32 %v1536_v41 }
0x1270   :  { %v2448_v2 = vpop.eup %2447 }
0x1271   :  { %v2014_v11 = vadd.f32 -1.0, %v2448_v2 }
0x1273   :  { %v1539_v8 = vsel %vm1534_vm11, %v1529_v35, %v2014_v11 }
0x1274   :  { %v1540_v12 = vpack.c.bf16 %v1539_v8, %v1539_v8 }
0x1276   :  { %2275 = vmatmul.mubr.msk.bf16.vlgmr.msra.gmra.mxu0 %vm218_vm6, %v1540_v12 }
0x1277   :  { %2295 = vmatpush3.bf16.msra.mxu0 %v2765_v62  ;;  %2298 = vmatprep.mubr.msk.bf16.mxu0 %vm2474_vm2, %v2473_v0 }
0x1278   :  { %2296 = vmatprep.subr.bf16.mxu0 %v2473_v0 }
0x127b   :  { %2297 = vmatpush3.bf16.msra.mxu0 %v2772_v5 }
0x127c   :  { %2302 = vmatprep.subr.bf16.mxu0 %v2473_v0 }
0x127e   :  { %2299 = vmatmul.mubr.msk.bf16.vlgmr.msra.gmra.mxu0 %vm218_vm6, %v2818_v25 }
0x127f   :  { %2303 = vmatpush3.bf16.msra.mxu0 %v2801_v58  ;;  %2306 = vmatprep.mubr.msk.bf16.mxu0 %vm2474_vm2, %v2473_v0 }
0x1280   :  { %2304 = vmatprep.subr.bf16.mxu0 %v2473_v0 }
0x1283   :  { %2305 = vmatpush3.bf16.msra.mxu0 %v2807_v59 }
0x1284   :  { %2310 = vmatprep.subr.bf16.mxu0 %v2473_v0 }
0x12dc   :  { %v1635_v45 = vpop.f32.mrf.mxu1 }
0x12dd   :  { %v1636_v59 = vadd.f32 %v2794_v32, %v1635_v45 }
0x12de   :  { %v2292_v62 = vpop.f32.mrf.mxu1 }
0x12e0   :  { %v1638_v44 = vpop.f32.mrf.mxu1 }
0x12e2   :  { %v2293_v5 = vpop.f32.mrf.mxu1 }
0x1336   :  { %v3039_v46 = vpop.f32.mrf.mxu0 }
0x1338   :  { %v2276_v18 = vpop.f32.mrf.mxu0 }
0x133a   :  { %v1581_v13 = vpop.f32.mrf.mxu0 }
0x133c   :  { %v2277_v25 = vpop.f32.mrf.mxu0 }
0x133e   :  { %v1675_v31 = vpop.f32.mrf.mxu0 }
0x133f   :  { %v1676_v58 = vadd.f32 %v2787_v26, %v1675_v31 }
0x1340   :  { %v2300_v42 = vpop.f32.mrf.mxu0 }
0x1341   :  { %1689 = vrot.lane.b32.xlu1 %v1676_v58, %s2476_s26  ;;  %v1681_v49 = vadd.f32 %v1676_v58, %v1636_v59 }
0x1342   :  { %v1678_v47 = vpop.f32.mrf.mxu0 }
0x1343   :  { %v1682_v54 = vsub.f32 0.0, %v1681_v49 }
0x1344   :  { %v2301_v50 = vpop.f32.mrf.mxu0 }
0x1345   :  { %v1683_v22 = vmul.f32 1.442695, %v1682_v54 }
0x1347   :  { %2449 = vpow2.f32 %v1683_v22 }
0x1354   :  { %v2450_v39 = vpop.eup %2449 }
0x1355   :  { %v1685_v14 = vadd.f32 1.0, %v2450_v39 }
0x1357   :  { %2451 = vrcp.f32 %v1685_v14 }
0x1364   :  { %v2452_v24 = vpop.eup %2451 }
0x1365   :  { %v1699_v4 = vsub.f32 1.0, %v2452_v24  ;;  %v1705_v3 = vmul.f32 %v2452_v24, %v2813_v21  ;;  %v705_v21 = vsub.f32 %v700_v17, %v3058_v51 }
0x1367   :  { %v706_v23 = vmul.f32 %v705_v21, %v705_v21 }
0x1369   :  { %v1097_v30 = vsel %vm218_vm6, %v706_v23, 0.0 }
0x13b3   :  { %v1690_v52 = vpop.permute.xlu1 %1689 }
0x13b4   :  { %v1692_v55 = vmul.f32 %v2452_v24, %v1690_v52 }
0x13b6   :  { %1694 = vrot.lane.b32.xlu0 %v1692_v55, %s2476_s26 }
0x1428   :  { %v1695_v26 = vpop.permute.xlu0 %1694 }
0x1429   :  { %v1697_v53 = vadd.f32 %v1695_v26, %v1636_v59 }
0x142b   :  { %2453 = vtanh.f32 %v1697_v53 }
0x1438   :  { %v2454_v56 = vpop.eup %2453 }
0x1439   :  { %1701 = vrot.lane.b32.xlu1 %v2454_v56, %s2477_s6 }
0x14ab   :  { %v1702_v32 = vpop.permute.xlu1 %1701 }
0x14ac   :  { %v1704_v57 = vmul.f32 %v1702_v32, %v1699_v4 }
0x14ae   :  { %v1706_v16 = vadd.f32 %v1705_v3, %v1704_v57  ;;  %v1125_v57 = vsel %vm203_vm3, %v2964_v63, 0.0 }
0x14b0   :  { %v1707_v48 = vpack.c.bf16 %v1706_v16, %v1706_v16 }
0x14b2   :  { %1709 = vrot.lane.b32.xlu0 %v1707_v48, %s2477_s6 }
0x14d1   :  { %1098 = vadd.xlane.f32.xlu0 %v1097_v30 }
0x14d5   :  { %1110 = vadd.xlane.f32.xlu0 %v1109_v19 }
0x1524   :  { %v1710_v15 = vpop.permute.xlu0 %1709 }
0x1525   :  { %2307 = vmatmul.mubr.msk.bf16.vlgmr.msra.gmra.mxu0 %vm218_vm6, %v1710_v15 }
0x1526   :  { %2311 = vmatpush3.bf16.msra.mxu0 %v2827_v27  ;;  %2314 = vmatprep.mubr.msk.bf16.mxu0 %vm2474_vm2, %v2473_v0  ;;  %vm1161_vm2 = vcmask 85072  }
0x1527   :  { %2312 = vmatprep.subr.bf16.mxu0 %v2473_v0 }
0x152a   :  { %2313 = vmatpush3.bf16.msra.mxu0 %v2834_v9 }
0x155a   :  { %v1099_v29 = vpop.xlane.xlu0 %1098 }
0x155b   :  { %v1100_v33 = vrot.slane %v1099_v29, 4 }
0x155d   :  { %v1101_v34 = vadd.f32 %v1100_v33, %v1099_v29 }
0x155e   :  { %v1111_v35 = vpop.xlane.xlu0 %1110 }
0x155f   :  { %v1102_v36 = vrot.slane %v1101_v34, 2  ;;  %v1112_v37 = vrot.slane %v1111_v35, 4 }
0x1561   :  { %v1113_v7 = vadd.f32 %v1112_v37, %v1111_v35  ;;  %v1103_v41 = vadd.f32 %v1102_v36, %v1101_v34 }
0x1563   :  { %v1114_v60 = vrot.slane %v1113_v7, 2  ;;  %v1104_v2 = vrot.slane %v1103_v41, 1 }
0x1565   :  { %v1105_v11 = vadd.f32 %v1104_v2, %v1103_v41  ;;  %v1115_v8 = vadd.f32 %v1114_v60, %v1113_v7 }
0x1567   :  { %2330 = vpush %v1105_v11  ;;  %v1116_v27 = vrot.slane %v1115_v8, 1 }
0x1569   :  { %v1117_v12 = vadd.f32 %v1116_v27, %v1115_v8 }
0x156b   :  { %2332 = vpush %v1117_v12 }
0x1598   :  { %s2331_s0 = spop %2330 }
0x1599   :  { %v1107_v0 = vstv %s2331_s0 }
0x159c   :  { %s2333_s2 = spop %2332 }
0x159d   :  { %v1119_v9 = vstv %s2333_s2 }
0x159e   :  { %v1120_v45 = vadd.f32 %v1119_v9, %v1107_v0 }
0x15a0   :  { %1162 = vst.msk [vmem:[%s3134_s3] sm:$0xf] %vm1161_vm2, %v1120_v45 }
0x15e5   :  { %v1748_v62 = vpop.f32.mrf.mxu0 }
0x15e6   :  { %v1749_v44 = vadd.f32 %v2841_v28, %v1748_v62 }
0x15e7   :  { %v2308_v5 = vpop.f32.mrf.mxu0 }
0x15e8   :  { %v1755_v18 = vmin.f32 %v1749_v44, 0.0  ;;  %vm1754_vm12 = vcmp.gt.f32.partialorder %v1749_v44, 0.0 }
0x15e9   :  { %v1751_v13 = vpop.f32.mrf.mxu0 }
0x15ea   :  { %v1756_v25 = vmul.f32 1.442695, %v1755_v18 }
0x15eb   :  { %v2309_v31 = vpop.f32.mrf.mxu0 }
0x15ec   :  { %2455 = vpow2.f32 %v1756_v25 }
0x15f9   :  { %v2456_v58 = vpop.eup %2455 }
0x15fa   :  { %v2019_v42 = vadd.f32 -1.0, %v2456_v58 }
0x15fc   :  { %v1759_v47 = vsel %vm1754_vm12, %v1749_v44, %v2019_v42 }
0x15fd   :  { %v1760_v50 = vpack.c.bf16 %v1759_v47, %v1759_v47 }
0x15ff   :  { %2315 = vmatmul.mubr.msk.bf16.vlgmr.msra.gmra.mxu0 %vm218_vm6, %v1760_v50 }
0x16bf   :  { %v1798_v59 = vpop.f32.mrf.mxu0 }
0x16c0   :  { %v1799_v49 = vadd.f32 %v2890_v1, %v1798_v59 }
0x16c1   :  { %v2316_v54 = vpop.f32.mrf.mxu0 }
0x16c2   :  { %v1805_v22 = vmin.f32 %v1799_v49, 0.0  ;;  %vm1804_vm13 = vcmp.gt.f32.partialorder %v1799_v49, 0.0 }
0x16c3   :  { %v1801_v39 = vpop.f32.mrf.mxu0 }
0x16c4   :  { %v1806_v28 = vmul.f32 1.442695, %v1805_v22 }
0x16c5   :  { %v2317_v14 = vpop.f32.mrf.mxu0 }
0x16c6   :  { %2457 = vpow2.f32 %v1806_v28 }
0x16d3   :  { %v2458_v24 = vpop.eup %2457 }
0x16d4   :  { %v2021_v52 = vadd.f32 -1.0, %v2458_v24 }
0x16d6   :  { %v1809_v55 = vsel %vm1804_vm13, %v1799_v49, %v2021_v52 }
0x16d7   :  { %v1810_v26 = vpack.c.bf16 %v1809_v55, %v1809_v55 }
0x16d9   :  { %2327 = vmatmul.mubr.msk.bf16.vlgmr.msra.gmra.mxu1 %vm1031_vm4, %v1810_v26 }
0x1799   :  { %v1848_v53 = vpop.f32.mrf.mxu1 }
0x179a   :  { %v1849_v56 = vadd.f32 %v2917_v43, %v1848_v53 }
0x179b   :  { %v2328_v4 = vpop.f32.mrf.mxu1 }
0x179c   :  { %2459 = vtanh.f32 %v1849_v56  ;;  %v1857_v1 = vsel %vm1078_vm7, %v1849_v56, -inf }
0x179d   :  { %1858 = vmax.xlane.f32.xlu1 %v1857_v1  ;;  %v1851_v32 = vpop.f32.mrf.mxu1 }
0x179f   :  { %v2329_v3 = vpop.f32.mrf.mxu1 }
0x17a1   :  { %1126 = vadd.xlane.f32.xlu1 %v1125_v57 }
0x17a9   :  { %v2460_v16 = vpop.eup %2459 }
0x17aa   :  { %v1855_v48 = vmul.f32 0.02, %v2460_v16 }
0x17ac   :  { %v2023_v17 = vadd.f32 -0.01, %v1855_v48 }
0x17ae   :  { %v1872_v21 = vadd.f32 %v2023_v17, %v2924_v6 }
0x17b0   :  { %2024 = vst.msk [vmem:[%s3134_s3 + $0x4] sm:$0xf] %vm1108_vm8, %v1872_v21  ;;  %v1873_v44 = vsub.f32 %v1872_v21, %v3064_v38 }
0x17b2   :  { %v1874_v18 = vmul.f32 %v1873_v44, %v1873_v44 }
0x17b4   :  { %v1886_v13 = vsel %vm1108_vm8, %v1874_v18, 0.0 }
0x1826   :  { %v1859_v43 = vpop.xlane.xlu1 %1858 }
0x1827   :  { %v1860_v23 = vsub.f32 %v1849_v56, %v1859_v43 }
0x1829   :  { %v1861_v20 = vmul.f32 1.442695, %v1860_v23 }
0x182a   :  { %v1127_v30 = vpop.xlane.xlu1 %1126 }
0x182b   :  { %2461 = vpow2.f32 %v1861_v20  ;;  %v1128_v40 = vrot.slane %v1127_v30, 4 }
0x182d   :  { %v1129_v19 = vadd.f32 %v1128_v40, %v1127_v30 }
0x182f   :  { %v1130_v15 = vrot.slane %v1129_v19, 2 }
0x1831   :  { %v1131_v63 = vadd.f32 %v1130_v15, %v1129_v19 }
0x1833   :  { %v1132_v29 = vrot.slane %v1131_v63, 1 }
0x1835   :  { %v1133_v33 = vadd.f32 %v1132_v29, %v1131_v63 }
0x1837   :  { %2334 = vpush %v1133_v33 }
0x1838   :  { %v2462_v34 = vpop.eup %2461 }
0x1839   :  { %1864 = vrot.lane.b32.xlu0 %v2462_v34, %s2479_s14 }
0x1868   :  { %s2335_s24 = spop %2334 }
0x1869   :  { %v1135_v6 = vstv %s2335_s24 }
0x186a   :  { %2463 = vrcp.f32 %v1135_v6 }
0x1877   :  { %v2464_v35 = vpop.eup %2463 }
0x1878   :  { %v1137_v36 = vmul.f32 %v2464_v35, %v2952_v61  ;;  %v1579_v61 = vadd.f32 %v3051_v10, %v3039_v46 }
0x187a   :  { %v1138_v37 = vadd.f32 1e-20, %v1137_v36  ;;  %v1584_v45 = vsub.f32 %v1579_v61, %v3058_v51 }
0x187c   :  { %2465 = vlog2.f32 %v1138_v37  ;;  %v1585_v62 = vmul.f32 %v1584_v45, %v1584_v45 }
0x187e   :  { %v1875_v5 = vsel %vm218_vm6, %v1585_v62, 0.0  ;;  %vm1163_vm6 = vcmask 93272  }
0x1889   :  { %v2466_v60 = vpop.eup %2465 }
0x188a   :  { %v1140_v2 = vmul.f32 0.6931472, %v2466_v60 }
0x188c   :  { %v1141_v11 = vmul.f32 %v1140_v2, %v1137_v36 }
0x18ab   :  { %v1865_v7 = vpop.permute.xlu0 %1864 }
0x18ac   :  { %v1867_v41 = vsel %vm203_vm3, %v1865_v7, 0.0 }
0x18ad   :  { %1868 = vadd.xlane.f32.xlu1 %v1867_v41 }
0x18be   :  { %1143 = vrot.lane.b32.xlu1 %v1141_v11, %s2479_s14 }
0x1936   :  { %v1869_v8 = vpop.xlane.xlu1 %1868 }
0x1937   :  { %2467 = vrcp.f32 %v1869_v8 }
0x193a   :  { %v1144_v27 = vpop.permute.xlu1 %1143 }
0x193b   :  { %v1146_v12 = vsel %vm203_vm3, %v1144_v27, 0.0 }
0x193c   :  { %1147 = vadd.xlane.f32.xlu1 %v1146_v12 }
0x1944   :  { %v2468_v0 = vpop.eup %2467 }
0x1945   :  { %v3098_v9 = vmul.f32 %v2468_v0, %v2462_v34 }
0x1947   :  { %1899 = vrot.lane.b32.xlu0 %v3098_v9, %s2479_s14  ;;  %2025 = vst.msk [vmem:[%s3134_s3 + $0x4] sm:$0xf] %vm1078_vm7, %v3098_v9 }
0x1966   :  { %1876 = vadd.xlane.f32.xlu0 %v1875_v5 }
0x196a   :  { %1887 = vadd.xlane.f32.xlu0 %v1886_v13 }
0x19b9   :  { %v1900_v25 = vpop.permute.xlu0 %1899 }
0x19ba   :  { %1941 = vst.msk [vmem:[#allocation3] sm:$0xf] %vm203_vm3, %v1900_v25  ;;  %1942 = vst.msk [vmem:[#allocation3 + $0x4] sm:$0xf] %vm203_vm3, %v1900_v25  ;;  %v1902_v31 = vsel %vm203_vm3, %v1900_v25, 0.0 }
0x19bb   :  { %1903 = vadd.xlane.f32.xlu1 %v1902_v31 }
0x19c5   :  { %v1148_v46 = vpop.xlane.xlu1 %1147 }
0x19c6   :  { %v1149_v10 = vrot.slane %v1148_v46, 4 }
0x19c8   :  { %v1150_v51 = vadd.f32 %v1149_v10, %v1148_v46 }
0x19ca   :  { %v1151_v58 = vrot.slane %v1150_v51, 2 }
0x19cc   :  { %v1152_v38 = vadd.f32 %v1151_v58, %v1150_v51 }
0x19ce   :  { %v1153_v42 = vrot.slane %v1152_v38, 1 }
0x19d0   :  { %v1154_v47 = vadd.f32 %v1153_v42, %v1152_v38 }
0x19d2   :  { %2336 = vpush %v1154_v47 }
0x19ef   :  { %v1877_v50 = vpop.xlane.xlu0 %1876 }
0x19f0   :  { %v1878_v59 = vrot.slane %v1877_v50, 4 }
0x19f2   :  { %v1879_v49 = vadd.f32 %v1878_v59, %v1877_v50 }
0x19f3   :  { %v1888_v54 = vpop.xlane.xlu0 %1887 }
0x19f4   :  { %v1880_v22 = vrot.slane %v1879_v49, 2  ;;  %v1889_v39 = vrot.slane %v1888_v54, 4 }
0x19f6   :  { %v1890_v28 = vadd.f32 %v1889_v39, %v1888_v54  ;;  %v1881_v14 = vadd.f32 %v1880_v22, %v1879_v49 }
0x19f8   :  { %v1891_v24 = vrot.slane %v1890_v28, 2  ;;  %v1882_v52 = vrot.slane %v1881_v14, 1 }
0x19fa   :  { %v1883_v55 = vadd.f32 %v1882_v52, %v1881_v14  ;;  %v1892_v26 = vadd.f32 %v1891_v24, %v1890_v28 }
0x19fc   :  { %2338 = vpush %v1883_v55  ;;  %v1893_v53 = vrot.slane %v1892_v26, 1 }
0x19fe   :  { %v1894_v56 = vadd.f32 %v1893_v53, %v1892_v26 }
0x1a00   :  { %2340 = vpush %v1894_v56 }
0x1a03   :  { %s2337_s28 = spop %2336 }
0x1a04   :  { %v1156_v4 = vstv %s2337_s28 }
0x1a05   :  { %v1157_v1 = vsub.f32 0.0, %v1156_v4 }
0x1a07   :  { %v1158_v32 = vmul.f32 0.001, %v1157_v1 }
0x1a09   :  { %1164 = vst.msk [vmem:[%s3134_s3] sm:$0xf] %vm1163_vm6, %v1158_v32 }
0x1a2d   :  { %s2339_s30 = spop %2338 }
0x1a2e   :  { %v1885_v3 = vstv %s2339_s30 }
0x1a31   :  { %s2341_s4 = spop %2340 }
0x1a32   :  { %v1896_v57 = vstv %s2341_s4 }
0x1a33   :  { %v1897_v16 = vadd.f32 %v1896_v57, %v1885_v3 }
0x1a35   :  { %2026 = vst.msk [vmem:[%s3134_s3 + $0x4] sm:$0xf] %vm1161_vm2, %v1897_v16 }
0x1a44   :  { %v1904_v48 = vpop.xlane.xlu1 %1903 }
0x1a45   :  { %v1905_v17 = vrot.slane %v1904_v48, 4 }
0x1a47   :  { %v1906_v21 = vadd.f32 %v1905_v17, %v1904_v48 }
0x1a49   :  { %v1907_v43 = vrot.slane %v1906_v21, 2 }
0x1a4b   :  { %v1908_v23 = vadd.f32 %v1907_v43, %v1906_v21 }
0x1a4d   :  { %v1909_v20 = vrot.slane %v1908_v23, 1 }
0x1a4f   :  { %v1910_v30 = vadd.f32 %v1909_v20, %v1908_v23 }
0x1a51   :  { %2342 = vpush %v1910_v30 }
0x1a82   :  { %s2343_s8 = spop %2342 }
0x1a83   :  { %v1912_v40 = vstv %s2343_s8 }
0x1a84   :  { %2469 = vrcp.f32 %v1912_v40 }
0x1a91   :  { %v2470_v19 = vpop.eup %2469 }
0x1a92   :  { %v1914_v15 = vmul.f32 %v2470_v19, %v3098_v9 }
0x1a94   :  { %v1915_v63 = vadd.f32 1e-20, %v1914_v15 }
0x1a96   :  { %2471 = vlog2.f32 %v1915_v63 }
0x1aa3   :  { %v2472_v29 = vpop.eup %2471 }
0x1aa4   :  { %v1917_v33 = vmul.f32 0.6931472, %v2472_v29 }
0x1aa6   :  { %v1918_v34 = vmul.f32 %v1917_v33, %v1914_v15 }
0x1aa8   :  { %1920 = vrot.lane.b32.xlu0 %v1918_v34, %s2479_s14 }
0x1b1a   :  { %v1921_v6 = vpop.permute.xlu0 %1920 }
0x1b1b   :  { %v1923_v35 = vsel %vm203_vm3, %v1921_v6, 0.0 }
0x1b1c   :  { %1924 = vadd.xlane.f32.xlu1 %v1923_v35 }
0x1ba5   :  { %v1925_v36 = vpop.xlane.xlu1 %1924 }
0x1ba6   :  { %v1926_v37 = vrot.slane %v1925_v36, 4 }
0x1ba8   :  { %v1927_v7 = vadd.f32 %v1926_v37, %v1925_v36 }
0x1baa   :  { %v1928_v41 = vrot.slane %v1927_v7, 2 }
0x1bac   :  { %v1929_v60 = vadd.f32 %v1928_v41, %v1927_v7 }
0x1bae   :  { %v1930_v2 = vrot.slane %v1929_v60, 1 }
0x1bb0   :  { %v1931_v11 = vadd.f32 %v1930_v2, %v1929_v60 }
0x1bb2   :  { %2344 = vpush %v1931_v11 }
0x1be3   :  { %s2345_s9 = spop %2344 }
0x1be4   :  { %v1933_v8 = vstv %s2345_s9 }
0x1be5   :  { %v1934_v27 = vsub.f32 0.0, %v1933_v8 }
0x1be7   :  { %v1935_v12 = vmul.f32 0.001, %v1934_v27 }
0x1be9   :  { %2027 = vst.msk [vmem:[%s3134_s3 + $0x4] sm:$0xf] %vm1163_vm6, %v1935_v12 }

</bundles_post_ra>
